<compile_context>
chip_gen: v7x
topology: tpu7x:2x2x1
jax: 0.10.0
libtpu: 0.0.40
codegen_flags: <defaults>
</compile_context>

<pallas_src>
import jax
import jax.numpy as jnp
from jax import lax
from jax.experimental import pallas as pl
from jax.experimental.pallas import tpu as pltpu

# ---- small deterministic model config ------------------------------------
VOCAB = 128
HIDDEN = 32
N_HEADS = 2
HEAD_DIM = HIDDEN // N_HEADS
FFN = 64
N_LAYERS = 2
SEQ = 8
BATCH = 2
LN_EPS = 1e-12
BS = BATCH * SEQ          # flattened rows per encoder
N_ENC = 2                 # bug / fix

# packed weight-slab layout (per layer): rows 0:HIDDEN are matrix rows,
# rows HIDDEN:HIDDEN+8 are the packed 1-row params.
C_QKV = 0                          # wqkv  : cols   0: 96
C_WO = 3 * HIDDEN                  # wo    : cols  96:128
C_W1 = C_WO + HIDDEN               # w1    : cols 128:192
C_W2T = C_W1 + FFN                 # w2^T  : cols 192:256
SLAB_C = C_W2T + FFN               # 256
SLAB_R = HIDDEN + 8                # 40


# ---- Pallas kernel: both encoders x all layers in one invocation ------------
def _dual_encoder_kernel(x_ref, bias_ref, w_ref, o_ref):
    scale = 1.0 / (HEAD_DIM ** 0.5)

    def layernorm(h, g, b):
        mu = jnp.mean(h, axis=-1, keepdims=True)
        var = jnp.mean((h - mu) ** 2, axis=-1, keepdims=True)
        return (h - mu) * lax.rsqrt(var + LN_EPS) * g + b

    for e in range(N_ENC):                          # static unroll: bug / fix encoder
        x = x_ref[e]                                # (BS, H)  f32 embedded hidden states
        bias = bias_ref[e]                          # (BS, BS) f32 additive attention bias

        for l in range(N_LAYERS):                   # static unroll (N_LAYERS = 2)
            slab = w_ref[e, l]                      # (SLAB_R, SLAB_C) bf16
            wqkv = slab[0:HIDDEN, C_QKV:C_WO]       # (H, 3H)
            wo = slab[0:HIDDEN, C_WO:C_W1]          # (H, H)
            w1 = slab[0:HIDDEN, C_W1:C_W2T]         # (H, FFN)
            w2t = slab[0:HIDDEN, C_W2T:SLAB_C]      # (H, FFN)  == w2 transposed
            vecs = slab[HIDDEN:SLAB_R, 0:3 * HIDDEN].astype(jnp.float32)  # (8, 3H)
            bqkv = vecs[0:1, :]                     # (1, 3H)
            bo = vecs[1:2, :HIDDEN]
            ln1g = vecs[2:3, :HIDDEN]
            ln1b = vecs[3:4, :HIDDEN]
            b1 = vecs[4:5, :FFN]
            b2 = vecs[5:6, :HIDDEN]
            ln2g = vecs[6:7, :HIDDEN]
            ln2b = vecs[7:8, :HIDDEN]

            # fused QKV projection: one MXU pass over the whole flattened batch
            qkv = jnp.dot(x.astype(jnp.bfloat16), wqkv,
                          preferred_element_type=jnp.float32) + bqkv      # (BS, 3H) f32

            # multi-head attention; heads written to adjacent lane slices and
            # projected with a single ctx @ wo matmul.
            ctxs = []
            for h in range(N_HEADS):                # static unroll (N_HEADS = 2)
                lo = h * HEAD_DIM
                hi = lo + HEAD_DIM
                qh = qkv[:, lo:hi].astype(jnp.bfloat16)
                kh = qkv[:, HIDDEN + lo:HIDDEN + hi].astype(jnp.bfloat16)
                vh = qkv[:, 2 * HIDDEN + lo:2 * HIDDEN + hi].astype(jnp.bfloat16)
                s = lax.dot_general(qh, kh, (((1,), (1,)), ((), ())),
                                    preferred_element_type=jnp.float32) * scale + bias
                s_max = jnp.max(s, axis=-1, keepdims=True)
                ex = jnp.exp(s - s_max)
                p = ex * pl.reciprocal(jnp.sum(ex, axis=-1, keepdims=True), approx=True)
                ctxs.append(jnp.dot(p.astype(jnp.bfloat16), vh,
                                    preferred_element_type=jnp.float32))  # (BS, HD)
            ctx = jnp.concatenate(ctxs, axis=-1)                           # (BS, H)
            attn = jnp.dot(ctx.astype(jnp.bfloat16), wo,
                           preferred_element_type=jnp.float32) + bo        # (BS, H)

            h1 = layernorm(x + attn, ln1g, ln1b)

            f = jnp.dot(h1.astype(jnp.bfloat16), w1,
                        preferred_element_type=jnp.float32) + b1           # (BS, FFN)
            # tanh-approx GELU  (reference nn.GELU() exact-erf differs at ~1e-3)
            f = 0.5 * f * (1.0 + jnp.tanh(0.7978845608028654
                                          * (f + 0.044715 * f * f * f)))
            f = lax.dot_general(f.astype(jnp.bfloat16), w2t, (((1,), (1,)), ((), ())),
                                preferred_element_type=jnp.float32) + b2   # (BS, H)
            x = layernorm(h1 + f, ln2g, ln2b)

        # emit the CLS (position 0) rows with a single store per encoder
        cls = jnp.concatenate([x[b * SEQ:b * SEQ + 1, :] for b in range(BATCH)], axis=0)
        o_ref[e] = cls


def _dual_encoder_pallas(x, bias, weights):
    """x: (2, BS, H) f32; bias: (2, BS, BS) f32; weights: (2, L, SLAB_R, SLAB_C) bf16."""
    return pl.pallas_call(
        _dual_encoder_kernel,
        out_shape=jax.ShapeDtypeStruct((N_ENC, BATCH, HIDDEN), jnp.float32),
    )(x, bias, weights)


# ---- parameter init (deterministic, synthetic) ------------------------------
def init_encoder_params(key):
    keys = jax.random.split(key, 2 + N_LAYERS)
    params = {
        "tok_emb": 0.02 * jax.random.normal(keys[0], (VOCAB, HIDDEN), jnp.float32),
        "pos_emb": 0.02 * jax.random.normal(keys[1], (SEQ, HIDDEN), jnp.float32),
        "emb_ln_g": jnp.ones((HIDDEN,), jnp.float32),
        "emb_ln_b": jnp.zeros((HIDDEN,), jnp.float32),
        "layers": [],
    }
    for l in range(N_LAYERS):
        lk = jax.random.split(keys[2 + l], 6)
        params["layers"].append({
            "wq": 0.02 * jax.random.normal(lk[0], (HIDDEN, HIDDEN), jnp.float32),
            "bq": jnp.zeros((1, HIDDEN), jnp.float32),
            "wk": 0.02 * jax.random.normal(lk[1], (HIDDEN, HIDDEN), jnp.float32),
            "bk": jnp.zeros((1, HIDDEN), jnp.float32),
            "wv": 0.02 * jax.random.normal(lk[2], (HIDDEN, HIDDEN), jnp.float32),
            "bv": jnp.zeros((1, HIDDEN), jnp.float32),
            "wo": 0.02 * jax.random.normal(lk[3], (HIDDEN, HIDDEN), jnp.float32),
            "bo": jnp.zeros((1, HIDDEN), jnp.float32),
            "ln1g": jnp.ones((1, HIDDEN), jnp.float32),
            "ln1b": jnp.zeros((1, HIDDEN), jnp.float32),
            "w1": 0.02 * jax.random.normal(lk[4], (HIDDEN, FFN), jnp.float32),
            "b1": jnp.zeros((1, FFN), jnp.float32),
            "w2": 0.02 * jax.random.normal(lk[5], (FFN, HIDDEN), jnp.float32),
            "b2": jnp.zeros((1, HIDDEN), jnp.float32),
            "ln2g": jnp.ones((1, HIDDEN), jnp.float32),
            "ln2b": jnp.zeros((1, HIDDEN), jnp.float32),
        })
    return params


# ---- plain-JAX glue (inside the same jit) -----------------------------------
def _embed(params, input_ids):
    # token gather + positional embedding + embedding LayerNorm
    # TODO(synk): embedding gather stays in plain JAX; a Pallas gather is not
    # worthwhile at this vocab/seq size.
    x = params["tok_emb"][input_ids] + params["pos_emb"][None, :, :]
    mu = x.mean(-1, keepdims=True)
    var = ((x - mu) ** 2).mean(-1, keepdims=True)
    x = (x - mu) * lax.rsqrt(var + LN_EPS) * params["emb_ln_g"] + params["emb_ln_b"]
    return x.reshape(BS, HIDDEN)                       # flatten batch*seq


def _attention_bias(attention_mask):
    # HF-style key mask (1=keep, 0=pad) + block-diagonal mask so flattened
    # batch rows never attend across batch elements.
    key_keep = attention_mask.reshape(-1).astype(jnp.float32)          # (BS,)
    row_batch = jnp.arange(BS) // SEQ
    same = row_batch[:, None] == row_batch[None, :]
    keep = same & (key_keep[None, :] > 0.5)
    return jnp.where(keep, 0.0, -1e9).astype(jnp.float32)              # (BS, BS)


def _pack_encoder_params(params):
    """Pack all per-layer weights of one encoder into a (L, SLAB_R, SLAB_C) bf16 slab."""
    def padv(v):
        return jnp.pad(v, ((0, 0), (0, 3 * HIDDEN - v.shape[1])))

    layer_slabs = []
    for lp in params["layers"]:
        mat = jnp.concatenate([
            jnp.concatenate([lp["wq"], lp["wk"], lp["wv"]], axis=1),   # (H, 3H)
            lp["wo"],                                                  # (H, H)
            lp["w1"],                                                  # (H, FFN)
            lp["w2"].T,                                                # (H, FFN)
        ], axis=1)                                                     # (H, SLAB_C)
        vecs = jnp.concatenate([
            jnp.concatenate([lp["bq"], lp["bk"], lp["bv"]], axis=1),   # (1, 3H)
            padv(lp["bo"]), padv(lp["ln1g"]), padv(lp["ln1b"]),
            padv(lp["b1"]), padv(lp["b2"]), padv(lp["ln2g"]), padv(lp["ln2b"]),
        ], axis=0)                                                     # (8, 3H)
        vecs = jnp.pad(vecs, ((0, 0), (0, SLAB_C - 3 * HIDDEN)))       # (8, SLAB_C)
        layer_slabs.append(jnp.concatenate([mat, vecs], axis=0))       # (SLAB_R, SLAB_C)
    return jnp.stack(layer_slabs).astype(jnp.bfloat16)                 # (L, SLAB_R, SLAB_C)


@jax.jit
def dual_encoder_forward(bug_params, fix_params,
                         bug_input_ids, bug_attention_mask,
                         fix_input_ids, fix_attention_mask):
    x = jnp.stack([_embed(bug_params, bug_input_ids),
                   _embed(fix_params, fix_input_ids)])                 # (2, BS, H)
    bias = jnp.stack([_attention_bias(bug_attention_mask),
                      _attention_bias(fix_attention_mask)])            # (2, BS, BS)
    weights = jnp.stack([_pack_encoder_params(bug_params),
                         _pack_encoder_params(fix_params)])            # (2, L, 40, 256) bf16

    cls = _dual_encoder_pallas(x, bias, weights)                       # (2, B, H)
    return cls[0], cls[1]                                              # bug_emb, fix_emb


if __name__ == "__main__":
    key = jax.random.PRNGKey(0)
    k_bug, k_fix, k_ids1, k_ids2 = jax.random.split(key, 4)

    bug_params = init_encoder_params(k_bug)
    fix_params = init_encoder_params(k_fix)

    bug_ids = jax.random.randint(k_ids1, (BATCH, SEQ), 0, VOCAB, dtype=jnp.int32)
    fix_ids = jax.random.randint(k_ids2, (BATCH, SEQ), 0, VOCAB, dtype=jnp.int32)
    # padding on the tail of each sequence
    pos = jnp.arange(SEQ)[None, :]
    bug_mask = (pos < 6).astype(jnp.int32).repeat(BATCH, axis=0)
    fix_mask = (pos < 7).astype(jnp.int32).repeat(BATCH, axis=0)

    bug_emb, fix_emb = dual_encoder_forward(
        bug_params, fix_params, bug_ids, bug_mask, fix_ids, fix_mask)
    jax.block_until_ready((bug_emb, fix_emb))

    assert bug_emb.shape == (BATCH, HIDDEN) and fix_emb.shape == (BATCH, HIDDEN)
    assert bug_emb.dtype == jnp.float32 and fix_emb.dtype == jnp.float32
    assert bool(jnp.isfinite(bug_emb).all()) and bool(jnp.isfinite(fix_emb).all())
    print("KERNEL_OK")
</pallas_src>

<mosaic_0001>
module attributes {stable_mosaic.version = 11 : i64} {
  func.func @_dual_encoder_kernel(%arg0: memref<2x16x32xf32, #tpu.memory_space<vmem>>, %arg1: memref<2x16x16xf32, #tpu.memory_space<vmem>>, %arg2: memref<2x2x40x256xbf16, #tpu.memory_space<vmem>>, %arg3: memref<2x2x32xf32, #tpu.memory_space<vmem>>) attributes {dimension_semantics = [], scalar_prefetch = 0 : i64, scratch_operands = 0 : i64, tpu.core_type = #tpu.core_type<tc>} {
    %c0 = arith.constant 0 : index
    %c0_0 = arith.constant 0 : index
    %c0_1 = arith.constant 0 : index
    %0 = vector.load %arg0[%c0, %c0_0, %c0_1] : memref<2x16x32xf32, #tpu.memory_space<vmem>>, vector<1x16x32xf32>
    %1 = vector.shape_cast %0 : vector<1x16x32xf32> to vector<16x32xf32>
    %c0_2 = arith.constant 0 : index
    %c0_3 = arith.constant 0 : index
    %c0_4 = arith.constant 0 : index
    %2 = vector.load %arg1[%c0_2, %c0_3, %c0_4] : memref<2x16x16xf32, #tpu.memory_space<vmem>>, vector<1x16x16xf32>
    %3 = vector.shape_cast %2 : vector<1x16x16xf32> to vector<16x16xf32>
    %c0_5 = arith.constant 0 : index
    %c0_6 = arith.constant 0 : index
    %c0_7 = arith.constant 0 : index
    %c0_8 = arith.constant 0 : index
    %4 = vector.load %arg2[%c0_5, %c0_6, %c0_7, %c0_8] : memref<2x2x40x256xbf16, #tpu.memory_space<vmem>>, vector<1x1x40x256xbf16>
    %5 = vector.shape_cast %4 : vector<1x1x40x256xbf16> to vector<40x256xbf16>
    %6 = vector.extract_strided_slice %5 {offsets = [0, 0], sizes = [32, 96], strides = [1, 1]} : vector<40x256xbf16> to vector<32x96xbf16>
    %7 = vector.extract_strided_slice %5 {offsets = [0, 96], sizes = [32, 32], strides = [1, 1]} : vector<40x256xbf16> to vector<32x32xbf16>
    %8 = vector.extract_strided_slice %5 {offsets = [0, 128], sizes = [32, 64], strides = [1, 1]} : vector<40x256xbf16> to vector<32x64xbf16>
    %9 = vector.extract_strided_slice %5 {offsets = [0, 192], sizes = [32, 64], strides = [1, 1]} : vector<40x256xbf16> to vector<32x64xbf16>
    %10 = vector.extract_strided_slice %5 {offsets = [32, 0], sizes = [8, 96], strides = [1, 1]} : vector<40x256xbf16> to vector<8x96xbf16>
    %11 = arith.extf %10 : vector<8x96xbf16> to vector<8x96xf32>
    %12 = vector.extract_strided_slice %11 {offsets = [0, 0], sizes = [1, 96], strides = [1, 1]} : vector<8x96xf32> to vector<1x96xf32>
    %13 = vector.extract_strided_slice %11 {offsets = [1, 0], sizes = [1, 32], strides = [1, 1]} : vector<8x96xf32> to vector<1x32xf32>
    %14 = vector.extract_strided_slice %11 {offsets = [2, 0], sizes = [1, 32], strides = [1, 1]} : vector<8x96xf32> to vector<1x32xf32>
    %15 = vector.extract_strided_slice %11 {offsets = [3, 0], sizes = [1, 32], strides = [1, 1]} : vector<8x96xf32> to vector<1x32xf32>
    %16 = vector.extract_strided_slice %11 {offsets = [4, 0], sizes = [1, 64], strides = [1, 1]} : vector<8x96xf32> to vector<1x64xf32>
    %17 = vector.extract_strided_slice %11 {offsets = [5, 0], sizes = [1, 32], strides = [1, 1]} : vector<8x96xf32> to vector<1x32xf32>
    %18 = vector.extract_strided_slice %11 {offsets = [6, 0], sizes = [1, 32], strides = [1, 1]} : vector<8x96xf32> to vector<1x32xf32>
    %19 = vector.extract_strided_slice %11 {offsets = [7, 0], sizes = [1, 32], strides = [1, 1]} : vector<8x96xf32> to vector<1x32xf32>
    %20 = arith.truncf %1 : vector<16x32xf32> to vector<16x32xbf16>
    %cst = arith.constant dense<0.000000e+00> : vector<16x96xf32>
    %21 = tpu.matmul %20, %6, %cst {dimension_numbers = #tpu.dot_dimension_numbers<[1], [0], [0], [1], [0, 0, 1, 1], [], []>} : vector<16x32xbf16>, vector<32x96xbf16>, vector<16x96xf32> -> vector<16x96xf32>
    %22 = vector.broadcast %12 : vector<1x96xf32> to vector<16x96xf32>
    %23 = arith.addf %21, %22 : vector<16x96xf32>
    %24 = vector.extract_strided_slice %23 {offsets = [0, 0], sizes = [16, 16], strides = [1, 1]} : vector<16x96xf32> to vector<16x16xf32>
    %25 = arith.truncf %24 : vector<16x16xf32> to vector<16x16xbf16>
    %26 = vector.extract_strided_slice %23 {offsets = [0, 32], sizes = [16, 16], strides = [1, 1]} : vector<16x96xf32> to vector<16x16xf32>
    %27 = arith.truncf %26 : vector<16x16xf32> to vector<16x16xbf16>
    %28 = vector.extract_strided_slice %23 {offsets = [0, 64], sizes = [16, 16], strides = [1, 1]} : vector<16x96xf32> to vector<16x16xf32>
    %29 = arith.truncf %28 : vector<16x16xf32> to vector<16x16xbf16>
    %cst_9 = arith.constant dense<0.000000e+00> : vector<16x16xf32>
    %30 = tpu.matmul %25, %27, %cst_9 {dimension_numbers = #tpu.dot_dimension_numbers<[1], [1], [0], [0], [0, 0, 1, 0], [], []>} : vector<16x16xbf16>, vector<16x16xbf16>, vector<16x16xf32> -> vector<16x16xf32>
    %cst_10 = arith.constant 2.500000e-01 : f32
    %31 = vector.broadcast %cst_10 : f32 to vector<16x16xf32>
    %32 = arith.mulf %30, %31 : vector<16x16xf32>
    %33 = arith.addf %32, %3 : vector<16x16xf32>
    %cst_11 = arith.constant dense<0xFF800000> : vector<16xf32>
    %34 = vector.multi_reduction <maximumf>, %33, %cst_11 [1] : vector<16x16xf32> to vector<16xf32>
    %35 = vector.shape_cast %34 : vector<16xf32> to vector<16x1xf32>
    %36 = vector.broadcast %35 : vector<16x1xf32> to vector<16x16xf32>
    %37 = arith.subf %33, %36 : vector<16x16xf32>
    %38 = math.exp %37 : vector<16x16xf32>
    %cst_12 = arith.constant dense<0.000000e+00> : vector<16xf32>
    %39 = vector.multi_reduction <add>, %38, %cst_12 [1] : vector<16x16xf32> to vector<16xf32>
    %40 = vector.shape_cast %39 : vector<16xf32> to vector<16x1xf32>
    %41 = tpu.reciprocal %40 {approx = true} : vector<16x1xf32> -> vector<16x1xf32>
    %42 = vector.broadcast %41 : vector<16x1xf32> to vector<16x16xf32>
    %43 = arith.mulf %38, %42 : vector<16x16xf32>
    %44 = arith.truncf %43 : vector<16x16xf32> to vector<16x16xbf16>
    %cst_13 = arith.constant dense<0.000000e+00> : vector<16x16xf32>
    %45 = tpu.matmul %44, %29, %cst_13 {dimension_numbers = #tpu.dot_dimension_numbers<[1], [0], [0], [1], [0, 0, 1, 1], [], []>} : vector<16x16xbf16>, vector<16x16xbf16>, vector<16x16xf32> -> vector<16x16xf32>
    %46 = vector.extract_strided_slice %23 {offsets = [0, 16], sizes = [16, 16], strides = [1, 1]} : vector<16x96xf32> to vector<16x16xf32>
    %47 = arith.truncf %46 : vector<16x16xf32> to vector<16x16xbf16>
    %48 = vector.extract_strided_slice %23 {offsets = [0, 48], sizes = [16, 16], strides = [1, 1]} : vector<16x96xf32> to vector<16x16xf32>
    %49 = arith.truncf %48 : vector<16x16xf32> to vector<16x16xbf16>
    %50 = vector.extract_strided_slice %23 {offsets = [0, 80], sizes = [16, 16], strides = [1, 1]} : vector<16x96xf32> to vector<16x16xf32>
    %51 = arith.truncf %50 : vector<16x16xf32> to vector<16x16xbf16>
    %cst_14 = arith.constant dense<0.000000e+00> : vector<16x16xf32>
    %52 = tpu.matmul %47, %49, %cst_14 {dimension_numbers = #tpu.dot_dimension_numbers<[1], [1], [0], [0], [0, 0, 1, 0], [], []>} : vector<16x16xbf16>, vector<16x16xbf16>, vector<16x16xf32> -> vector<16x16xf32>
    %cst_15 = arith.constant 2.500000e-01 : f32
    %53 = vector.broadcast %cst_15 : f32 to vector<16x16xf32>
    %54 = arith.mulf %52, %53 : vector<16x16xf32>
    %55 = arith.addf %54, %3 : vector<16x16xf32>
    %cst_16 = arith.constant dense<0xFF800000> : vector<16xf32>
    %56 = vector.multi_reduction <maximumf>, %55, %cst_16 [1] : vector<16x16xf32> to vector<16xf32>
    %57 = vector.shape_cast %56 : vector<16xf32> to vector<16x1xf32>
    %58 = vector.broadcast %57 : vector<16x1xf32> to vector<16x16xf32>
    %59 = arith.subf %55, %58 : vector<16x16xf32>
    %60 = math.exp %59 : vector<16x16xf32>
    %cst_17 = arith.constant dense<0.000000e+00> : vector<16xf32>
    %61 = vector.multi_reduction <add>, %60, %cst_17 [1] : vector<16x16xf32> to vector<16xf32>
    %62 = vector.shape_cast %61 : vector<16xf32> to vector<16x1xf32>
    %63 = tpu.reciprocal %62 {approx = true} : vector<16x1xf32> -> vector<16x1xf32>
    %64 = vector.broadcast %63 : vector<16x1xf32> to vector<16x16xf32>
    %65 = arith.mulf %60, %64 : vector<16x16xf32>
    %66 = arith.truncf %65 : vector<16x16xf32> to vector<16x16xbf16>
    %cst_18 = arith.constant dense<0.000000e+00> : vector<16x16xf32>
    %67 = tpu.matmul %66, %51, %cst_18 {dimension_numbers = #tpu.dot_dimension_numbers<[1], [0], [0], [1], [0, 0, 1, 1], [], []>} : vector<16x16xbf16>, vector<16x16xbf16>, vector<16x16xf32> -> vector<16x16xf32>
    %68 = tpu.concatenate %45, %67 in 1 : vector<16x16xf32>, vector<16x16xf32> -> vector<16x32xf32>
    %69 = arith.truncf %68 : vector<16x32xf32> to vector<16x32xbf16>
    %cst_19 = arith.constant dense<0.000000e+00> : vector<16x32xf32>
    %70 = tpu.matmul %69, %7, %cst_19 {dimension_numbers = #tpu.dot_dimension_numbers<[1], [0], [0], [1], [0, 0, 1, 1], [], []>} : vector<16x32xbf16>, vector<32x32xbf16>, vector<16x32xf32> -> vector<16x32xf32>
    %71 = vector.broadcast %13 : vector<1x32xf32> to vector<16x32xf32>
    %72 = arith.addf %70, %71 : vector<16x32xf32>
    %73 = arith.addf %1, %72 : vector<16x32xf32>
    %cst_20 = arith.constant dense<0.000000e+00> : vector<16xf32>
    %74 = vector.multi_reduction <add>, %73, %cst_20 [1] : vector<16x32xf32> to vector<16xf32>
    %75 = vector.shape_cast %74 : vector<16xf32> to vector<16x1xf32>
    %cst_21 = arith.constant 3.200000e+01 : f32
    %76 = vector.broadcast %cst_21 : f32 to vector<16x1xf32>
    %77 = arith.divf %75, %76 : vector<16x1xf32>
    %78 = vector.broadcast %77 : vector<16x1xf32> to vector<16x32xf32>
    %79 = arith.subf %73, %78 : vector<16x32xf32>
    %80 = arith.mulf %79, %79 : vector<16x32xf32>
    %cst_22 = arith.constant dense<0.000000e+00> : vector<16xf32>
    %81 = vector.multi_reduction <add>, %80, %cst_22 [1] : vector<16x32xf32> to vector<16xf32>
    %82 = vector.shape_cast %81 : vector<16xf32> to vector<16x1xf32>
    %cst_23 = arith.constant 3.200000e+01 : f32
    %83 = vector.broadcast %cst_23 : f32 to vector<16x1xf32>
    %84 = arith.divf %82, %83 : vector<16x1xf32>
    %85 = vector.broadcast %77 : vector<16x1xf32> to vector<16x32xf32>
    %86 = arith.subf %73, %85 : vector<16x32xf32>
    %cst_24 = arith.constant 9.99999996E-13 : f32
    %87 = vector.broadcast %cst_24 : f32 to vector<16x1xf32>
    %88 = arith.addf %84, %87 : vector<16x1xf32>
    %89 = math.rsqrt %88 : vector<16x1xf32>
    %90 = vector.broadcast %89 : vector<16x1xf32> to vector<16x32xf32>
    %91 = arith.mulf %86, %90 : vector<16x32xf32>
    %92 = vector.broadcast %14 : vector<1x32xf32> to vector<16x32xf32>
    %93 = arith.mulf %91, %92 : vector<16x32xf32>
    %94 = vector.broadcast %15 : vector<1x32xf32> to vector<16x32xf32>
    %95 = arith.addf %93, %94 : vector<16x32xf32>
    %96 = arith.truncf %95 : vector<16x32xf32> to vector<16x32xbf16>
    %cst_25 = arith.constant dense<0.000000e+00> : vector<16x64xf32>
    %97 = tpu.matmul %96, %8, %cst_25 {dimension_numbers = #tpu.dot_dimension_numbers<[1], [0], [0], [1], [0, 0, 1, 1], [], []>} : vector<16x32xbf16>, vector<32x64xbf16>, vector<16x64xf32> -> vector<16x64xf32>
    %98 = vector.broadcast %16 : vector<1x64xf32> to vector<16x64xf32>
    %99 = arith.addf %97, %98 : vector<16x64xf32>
    %cst_26 = arith.constant 5.000000e-01 : f32
    %100 = vector.broadcast %cst_26 : f32 to vector<16x64xf32>
    %101 = arith.mulf %100, %99 : vector<16x64xf32>
    %cst_27 = arith.constant 4.471500e-02 : f32
    %102 = vector.broadcast %cst_27 : f32 to vector<16x64xf32>
    %103 = arith.mulf %102, %99 : vector<16x64xf32>
    %104 = arith.mulf %103, %99 : vector<16x64xf32>
    %105 = arith.mulf %104, %99 : vector<16x64xf32>
    %106 = arith.addf %99, %105 : vector<16x64xf32>
    %cst_28 = arith.constant 0.797884583 : f32
    %107 = vector.broadcast %cst_28 : f32 to vector<16x64xf32>
    %108 = arith.mulf %107, %106 : vector<16x64xf32>
    %109 = math.tanh %108 : vector<16x64xf32>
    %cst_29 = arith.constant 1.000000e+00 : f32
    %110 = vector.broadcast %cst_29 : f32 to vector<16x64xf32>
    %111 = arith.addf %110, %109 : vector<16x64xf32>
    %112 = arith.mulf %101, %111 : vector<16x64xf32>
    %113 = arith.truncf %112 : vector<16x64xf32> to vector<16x64xbf16>
    %cst_30 = arith.constant dense<0.000000e+00> : vector<16x32xf32>
    %114 = tpu.matmul %113, %9, %cst_30 {dimension_numbers = #tpu.dot_dimension_numbers<[1], [1], [0], [0], [0, 0, 1, 0], [], []>} : vector<16x64xbf16>, vector<32x64xbf16>, vector<16x32xf32> -> vector<16x32xf32>
    %115 = vector.broadcast %17 : vector<1x32xf32> to vector<16x32xf32>
    %116 = arith.addf %114, %115 : vector<16x32xf32>
    %117 = arith.addf %95, %116 : vector<16x32xf32>
    %cst_31 = arith.constant dense<0.000000e+00> : vector<16xf32>
    %118 = vector.multi_reduction <add>, %117, %cst_31 [1] : vector<16x32xf32> to vector<16xf32>
    %119 = vector.shape_cast %118 : vector<16xf32> to vector<16x1xf32>
    %cst_32 = arith.constant 3.200000e+01 : f32
    %120 = vector.broadcast %cst_32 : f32 to vector<16x1xf32>
    %121 = arith.divf %119, %120 : vector<16x1xf32>
    %122 = vector.broadcast %121 : vector<16x1xf32> to vector<16x32xf32>
    %123 = arith.subf %117, %122 : vector<16x32xf32>
    %124 = arith.mulf %123, %123 : vector<16x32xf32>
    %cst_33 = arith.constant dense<0.000000e+00> : vector<16xf32>
    %125 = vector.multi_reduction <add>, %124, %cst_33 [1] : vector<16x32xf32> to vector<16xf32>
    %126 = vector.shape_cast %125 : vector<16xf32> to vector<16x1xf32>
    %cst_34 = arith.constant 3.200000e+01 : f32
    %127 = vector.broadcast %cst_34 : f32 to vector<16x1xf32>
    %128 = arith.divf %126, %127 : vector<16x1xf32>
    %129 = vector.broadcast %121 : vector<16x1xf32> to vector<16x32xf32>
    %130 = arith.subf %117, %129 : vector<16x32xf32>
    %cst_35 = arith.constant 9.99999996E-13 : f32
    %131 = vector.broadcast %cst_35 : f32 to vector<16x1xf32>
    %132 = arith.addf %128, %131 : vector<16x1xf32>
    %133 = math.rsqrt %132 : vector<16x1xf32>
    %134 = vector.broadcast %133 : vector<16x1xf32> to vector<16x32xf32>
    %135 = arith.mulf %130, %134 : vector<16x32xf32>
    %136 = vector.broadcast %18 : vector<1x32xf32> to vector<16x32xf32>
    %137 = arith.mulf %135, %136 : vector<16x32xf32>
    %138 = vector.broadcast %19 : vector<1x32xf32> to vector<16x32xf32>
    %139 = arith.addf %137, %138 : vector<16x32xf32>
    %c0_36 = arith.constant 0 : index
    %c1 = arith.constant 1 : index
    %c0_37 = arith.constant 0 : index
    %c0_38 = arith.constant 0 : index
    %140 = vector.load %arg2[%c0_36, %c1, %c0_37, %c0_38] : memref<2x2x40x256xbf16, #tpu.memory_space<vmem>>, vector<1x1x40x256xbf16>
    %141 = vector.shape_cast %140 : vector<1x1x40x256xbf16> to vector<40x256xbf16>
    %142 = vector.extract_strided_slice %141 {offsets = [0, 0], sizes = [32, 96], strides = [1, 1]} : vector<40x256xbf16> to vector<32x96xbf16>
    %143 = vector.extract_strided_slice %141 {offsets = [0, 96], sizes = [32, 32], strides = [1, 1]} : vector<40x256xbf16> to vector<32x32xbf16>
    %144 = vector.extract_strided_slice %141 {offsets = [0, 128], sizes = [32, 64], strides = [1, 1]} : vector<40x256xbf16> to vector<32x64xbf16>
    %145 = vector.extract_strided_slice %141 {offsets = [0, 192], sizes = [32, 64], strides = [1, 1]} : vector<40x256xbf16> to vector<32x64xbf16>
    %146 = vector.extract_strided_slice %141 {offsets = [32, 0], sizes = [8, 96], strides = [1, 1]} : vector<40x256xbf16> to vector<8x96xbf16>
    %147 = arith.extf %146 : vector<8x96xbf16> to vector<8x96xf32>
    %148 = vector.extract_strided_slice %147 {offsets = [0, 0], sizes = [1, 96], strides = [1, 1]} : vector<8x96xf32> to vector<1x96xf32>
    %149 = vector.extract_strided_slice %147 {offsets = [1, 0], sizes = [1, 32], strides = [1, 1]} : vector<8x96xf32> to vector<1x32xf32>
    %150 = vector.extract_strided_slice %147 {offsets = [2, 0], sizes = [1, 32], strides = [1, 1]} : vector<8x96xf32> to vector<1x32xf32>
    %151 = vector.extract_strided_slice %147 {offsets = [3, 0], sizes = [1, 32], strides = [1, 1]} : vector<8x96xf32> to vector<1x32xf32>
    %152 = vector.extract_strided_slice %147 {offsets = [4, 0], sizes = [1, 64], strides = [1, 1]} : vector<8x96xf32> to vector<1x64xf32>
    %153 = vector.extract_strided_slice %147 {offsets = [5, 0], sizes = [1, 32], strides = [1, 1]} : vector<8x96xf32> to vector<1x32xf32>
    %154 = vector.extract_strided_slice %147 {offsets = [6, 0], sizes = [1, 32], strides = [1, 1]} : vector<8x96xf32> to vector<1x32xf32>
    %155 = vector.extract_strided_slice %147 {offsets = [7, 0], sizes = [1, 32], strides = [1, 1]} : vector<8x96xf32> to vector<1x32xf32>
    %156 = arith.truncf %139 : vector<16x32xf32> to vector<16x32xbf16>
    %cst_39 = arith.constant dense<0.000000e+00> : vector<16x96xf32>
    %157 = tpu.matmul %156, %142, %cst_39 {dimension_numbers = #tpu.dot_dimension_numbers<[1], [0], [0], [1], [0, 0, 1, 1], [], []>} : vector<16x32xbf16>, vector<32x96xbf16>, vector<16x96xf32> -> vector<16x96xf32>
    %158 = vector.broadcast %148 : vector<1x96xf32> to vector<16x96xf32>
    %159 = arith.addf %157, %158 : vector<16x96xf32>
    %160 = vector.extract_strided_slice %159 {offsets = [0, 0], sizes = [16, 16], strides = [1, 1]} : vector<16x96xf32> to vector<16x16xf32>
    %161 = arith.truncf %160 : vector<16x16xf32> to vector<16x16xbf16>
    %162 = vector.extract_strided_slice %159 {offsets = [0, 32], sizes = [16, 16], strides = [1, 1]} : vector<16x96xf32> to vector<16x16xf32>
    %163 = arith.truncf %162 : vector<16x16xf32> to vector<16x16xbf16>
    %164 = vector.extract_strided_slice %159 {offsets = [0, 64], sizes = [16, 16], strides = [1, 1]} : vector<16x96xf32> to vector<16x16xf32>
    %165 = arith.truncf %164 : vector<16x16xf32> to vector<16x16xbf16>
    %cst_40 = arith.constant dense<0.000000e+00> : vector<16x16xf32>
    %166 = tpu.matmul %161, %163, %cst_40 {dimension_numbers = #tpu.dot_dimension_numbers<[1], [1], [0], [0], [0, 0, 1, 0], [], []>} : vector<16x16xbf16>, vector<16x16xbf16>, vector<16x16xf32> -> vector<16x16xf32>
    %cst_41 = arith.constant 2.500000e-01 : f32
    %167 = vector.broadcast %cst_41 : f32 to vector<16x16xf32>
    %168 = arith.mulf %166, %167 : vector<16x16xf32>
    %169 = arith.addf %168, %3 : vector<16x16xf32>
    %cst_42 = arith.constant dense<0xFF800000> : vector<16xf32>
    %170 = vector.multi_reduction <maximumf>, %169, %cst_42 [1] : vector<16x16xf32> to vector<16xf32>
    %171 = vector.shape_cast %170 : vector<16xf32> to vector<16x1xf32>
    %172 = vector.broadcast %171 : vector<16x1xf32> to vector<16x16xf32>
    %173 = arith.subf %169, %172 : vector<16x16xf32>
    %174 = math.exp %173 : vector<16x16xf32>
    %cst_43 = arith.constant dense<0.000000e+00> : vector<16xf32>
    %175 = vector.multi_reduction <add>, %174, %cst_43 [1] : vector<16x16xf32> to vector<16xf32>
    %176 = vector.shape_cast %175 : vector<16xf32> to vector<16x1xf32>
    %177 = tpu.reciprocal %176 {approx = true} : vector<16x1xf32> -> vector<16x1xf32>
    %178 = vector.broadcast %177 : vector<16x1xf32> to vector<16x16xf32>
    %179 = arith.mulf %174, %178 : vector<16x16xf32>
    %180 = arith.truncf %179 : vector<16x16xf32> to vector<16x16xbf16>
    %cst_44 = arith.constant dense<0.000000e+00> : vector<16x16xf32>
    %181 = tpu.matmul %180, %165, %cst_44 {dimension_numbers = #tpu.dot_dimension_numbers<[1], [0], [0], [1], [0, 0, 1, 1], [], []>} : vector<16x16xbf16>, vector<16x16xbf16>, vector<16x16xf32> -> vector<16x16xf32>
    %182 = vector.extract_strided_slice %159 {offsets = [0, 16], sizes = [16, 16], strides = [1, 1]} : vector<16x96xf32> to vector<16x16xf32>
    %183 = arith.truncf %182 : vector<16x16xf32> to vector<16x16xbf16>
    %184 = vector.extract_strided_slice %159 {offsets = [0, 48], sizes = [16, 16], strides = [1, 1]} : vector<16x96xf32> to vector<16x16xf32>
    %185 = arith.truncf %184 : vector<16x16xf32> to vector<16x16xbf16>
    %186 = vector.extract_strided_slice %159 {offsets = [0, 80], sizes = [16, 16], strides = [1, 1]} : vector<16x96xf32> to vector<16x16xf32>
    %187 = arith.truncf %186 : vector<16x16xf32> to vector<16x16xbf16>
    %cst_45 = arith.constant dense<0.000000e+00> : vector<16x16xf32>
    %188 = tpu.matmul %183, %185, %cst_45 {dimension_numbers = #tpu.dot_dimension_numbers<[1], [1], [0], [0], [0, 0, 1, 0], [], []>} : vector<16x16xbf16>, vector<16x16xbf16>, vector<16x16xf32> -> vector<16x16xf32>
    %cst_46 = arith.constant 2.500000e-01 : f32
    %189 = vector.broadcast %cst_46 : f32 to vector<16x16xf32>
    %190 = arith.mulf %188, %189 : vector<16x16xf32>
    %191 = arith.addf %190, %3 : vector<16x16xf32>
    %cst_47 = arith.constant dense<0xFF800000> : vector<16xf32>
    %192 = vector.multi_reduction <maximumf>, %191, %cst_47 [1] : vector<16x16xf32> to vector<16xf32>
    %193 = vector.shape_cast %192 : vector<16xf32> to vector<16x1xf32>
    %194 = vector.broadcast %193 : vector<16x1xf32> to vector<16x16xf32>
    %195 = arith.subf %191, %194 : vector<16x16xf32>
    %196 = math.exp %195 : vector<16x16xf32>
    %cst_48 = arith.constant dense<0.000000e+00> : vector<16xf32>
    %197 = vector.multi_reduction <add>, %196, %cst_48 [1] : vector<16x16xf32> to vector<16xf32>
    %198 = vector.shape_cast %197 : vector<16xf32> to vector<16x1xf32>
    %199 = tpu.reciprocal %198 {approx = true} : vector<16x1xf32> -> vector<16x1xf32>
    %200 = vector.broadcast %199 : vector<16x1xf32> to vector<16x16xf32>
    %201 = arith.mulf %196, %200 : vector<16x16xf32>
    %202 = arith.truncf %201 : vector<16x16xf32> to vector<16x16xbf16>
    %cst_49 = arith.constant dense<0.000000e+00> : vector<16x16xf32>
    %203 = tpu.matmul %202, %187, %cst_49 {dimension_numbers = #tpu.dot_dimension_numbers<[1], [0], [0], [1], [0, 0, 1, 1], [], []>} : vector<16x16xbf16>, vector<16x16xbf16>, vector<16x16xf32> -> vector<16x16xf32>
    %204 = tpu.concatenate %181, %203 in 1 : vector<16x16xf32>, vector<16x16xf32> -> vector<16x32xf32>
    %205 = arith.truncf %204 : vector<16x32xf32> to vector<16x32xbf16>
    %cst_50 = arith.constant dense<0.000000e+00> : vector<16x32xf32>
    %206 = tpu.matmul %205, %143, %cst_50 {dimension_numbers = #tpu.dot_dimension_numbers<[1], [0], [0], [1], [0, 0, 1, 1], [], []>} : vector<16x32xbf16>, vector<32x32xbf16>, vector<16x32xf32> -> vector<16x32xf32>
    %207 = vector.broadcast %149 : vector<1x32xf32> to vector<16x32xf32>
    %208 = arith.addf %206, %207 : vector<16x32xf32>
    %209 = arith.addf %139, %208 : vector<16x32xf32>
    %cst_51 = arith.constant dense<0.000000e+00> : vector<16xf32>
    %210 = vector.multi_reduction <add>, %209, %cst_51 [1] : vector<16x32xf32> to vector<16xf32>
    %211 = vector.shape_cast %210 : vector<16xf32> to vector<16x1xf32>
    %cst_52 = arith.constant 3.200000e+01 : f32
    %212 = vector.broadcast %cst_52 : f32 to vector<16x1xf32>
    %213 = arith.divf %211, %212 : vector<16x1xf32>
    %214 = vector.broadcast %213 : vector<16x1xf32> to vector<16x32xf32>
    %215 = arith.subf %209, %214 : vector<16x32xf32>
    %216 = arith.mulf %215, %215 : vector<16x32xf32>
    %cst_53 = arith.constant dense<0.000000e+00> : vector<16xf32>
    %217 = vector.multi_reduction <add>, %216, %cst_53 [1] : vector<16x32xf32> to vector<16xf32>
    %218 = vector.shape_cast %217 : vector<16xf32> to vector<16x1xf32>
    %cst_54 = arith.constant 3.200000e+01 : f32
    %219 = vector.broadcast %cst_54 : f32 to vector<16x1xf32>
    %220 = arith.divf %218, %219 : vector<16x1xf32>
    %221 = vector.broadcast %213 : vector<16x1xf32> to vector<16x32xf32>
    %222 = arith.subf %209, %221 : vector<16x32xf32>
    %cst_55 = arith.constant 9.99999996E-13 : f32
    %223 = vector.broadcast %cst_55 : f32 to vector<16x1xf32>
    %224 = arith.addf %220, %223 : vector<16x1xf32>
    %225 = math.rsqrt %224 : vector<16x1xf32>
    %226 = vector.broadcast %225 : vector<16x1xf32> to vector<16x32xf32>
    %227 = arith.mulf %222, %226 : vector<16x32xf32>
    %228 = vector.broadcast %150 : vector<1x32xf32> to vector<16x32xf32>
    %229 = arith.mulf %227, %228 : vector<16x32xf32>
    %230 = vector.broadcast %151 : vector<1x32xf32> to vector<16x32xf32>
    %231 = arith.addf %229, %230 : vector<16x32xf32>
    %232 = arith.truncf %231 : vector<16x32xf32> to vector<16x32xbf16>
    %cst_56 = arith.constant dense<0.000000e+00> : vector<16x64xf32>
    %233 = tpu.matmul %232, %144, %cst_56 {dimension_numbers = #tpu.dot_dimension_numbers<[1], [0], [0], [1], [0, 0, 1, 1], [], []>} : vector<16x32xbf16>, vector<32x64xbf16>, vector<16x64xf32> -> vector<16x64xf32>
    %234 = vector.broadcast %152 : vector<1x64xf32> to vector<16x64xf32>
    %235 = arith.addf %233, %234 : vector<16x64xf32>
    %cst_57 = arith.constant 5.000000e-01 : f32
    %236 = vector.broadcast %cst_57 : f32 to vector<16x64xf32>
    %237 = arith.mulf %236, %235 : vector<16x64xf32>
    %cst_58 = arith.constant 4.471500e-02 : f32
    %238 = vector.broadcast %cst_58 : f32 to vector<16x64xf32>
    %239 = arith.mulf %238, %235 : vector<16x64xf32>
    %240 = arith.mulf %239, %235 : vector<16x64xf32>
    %241 = arith.mulf %240, %235 : vector<16x64xf32>
    %242 = arith.addf %235, %241 : vector<16x64xf32>
    %cst_59 = arith.constant 0.797884583 : f32
    %243 = vector.broadcast %cst_59 : f32 to vector<16x64xf32>
    %244 = arith.mulf %243, %242 : vector<16x64xf32>
    %245 = math.tanh %244 : vector<16x64xf32>
    %cst_60 = arith.constant 1.000000e+00 : f32
    %246 = vector.broadcast %cst_60 : f32 to vector<16x64xf32>
    %247 = arith.addf %246, %245 : vector<16x64xf32>
    %248 = arith.mulf %237, %247 : vector<16x64xf32>
    %249 = arith.truncf %248 : vector<16x64xf32> to vector<16x64xbf16>
    %cst_61 = arith.constant dense<0.000000e+00> : vector<16x32xf32>
    %250 = tpu.matmul %249, %145, %cst_61 {dimension_numbers = #tpu.dot_dimension_numbers<[1], [1], [0], [0], [0, 0, 1, 0], [], []>} : vector<16x64xbf16>, vector<32x64xbf16>, vector<16x32xf32> -> vector<16x32xf32>
    %251 = vector.broadcast %153 : vector<1x32xf32> to vector<16x32xf32>
    %252 = arith.addf %250, %251 : vector<16x32xf32>
    %253 = arith.addf %231, %252 : vector<16x32xf32>
    %cst_62 = arith.constant dense<0.000000e+00> : vector<16xf32>
    %254 = vector.multi_reduction <add>, %253, %cst_62 [1] : vector<16x32xf32> to vector<16xf32>
    %255 = vector.shape_cast %254 : vector<16xf32> to vector<16x1xf32>
    %cst_63 = arith.constant 3.200000e+01 : f32
    %256 = vector.broadcast %cst_63 : f32 to vector<16x1xf32>
    %257 = arith.divf %255, %256 : vector<16x1xf32>
    %258 = vector.broadcast %257 : vector<16x1xf32> to vector<16x32xf32>
    %259 = arith.subf %253, %258 : vector<16x32xf32>
    %260 = arith.mulf %259, %259 : vector<16x32xf32>
    %cst_64 = arith.constant dense<0.000000e+00> : vector<16xf32>
    %261 = vector.multi_reduction <add>, %260, %cst_64 [1] : vector<16x32xf32> to vector<16xf32>
    %262 = vector.shape_cast %261 : vector<16xf32> to vector<16x1xf32>
    %cst_65 = arith.constant 3.200000e+01 : f32
    %263 = vector.broadcast %cst_65 : f32 to vector<16x1xf32>
    %264 = arith.divf %262, %263 : vector<16x1xf32>
    %265 = vector.broadcast %257 : vector<16x1xf32> to vector<16x32xf32>
    %266 = arith.subf %253, %265 : vector<16x32xf32>
    %cst_66 = arith.constant 9.99999996E-13 : f32
    %267 = vector.broadcast %cst_66 : f32 to vector<16x1xf32>
    %268 = arith.addf %264, %267 : vector<16x1xf32>
    %269 = math.rsqrt %268 : vector<16x1xf32>
    %270 = vector.broadcast %269 : vector<16x1xf32> to vector<16x32xf32>
    %271 = arith.mulf %266, %270 : vector<16x32xf32>
    %272 = vector.broadcast %154 : vector<1x32xf32> to vector<16x32xf32>
    %273 = arith.mulf %271, %272 : vector<16x32xf32>
    %274 = vector.broadcast %155 : vector<1x32xf32> to vector<16x32xf32>
    %275 = arith.addf %273, %274 : vector<16x32xf32>
    %276 = vector.extract_strided_slice %275 {offsets = [0, 0], sizes = [1, 32], strides = [1, 1]} : vector<16x32xf32> to vector<1x32xf32>
    %277 = vector.extract_strided_slice %275 {offsets = [8, 0], sizes = [1, 32], strides = [1, 1]} : vector<16x32xf32> to vector<1x32xf32>
    %278 = tpu.concatenate %276, %277 in 0 : vector<1x32xf32>, vector<1x32xf32> -> vector<2x32xf32>
    %c0_67 = arith.constant 0 : index
    %c0_68 = arith.constant 0 : index
    %c0_69 = arith.constant 0 : index
    %279 = vector.load %arg3[%c0_67, %c0_68, %c0_69] : memref<2x2x32xf32, #tpu.memory_space<vmem>>, vector<1x2x32xf32>
    %280 = vector.shape_cast %279 : vector<1x2x32xf32> to vector<2x32xf32>
    %281 = vector.shape_cast %278 : vector<2x32xf32> to vector<1x2x32xf32>
    tpu.vector_store %arg3[%c0_67, %c0_68, %c0_69], %281 {strides = array<i32>} : memref<2x2x32xf32, #tpu.memory_space<vmem>>, vector<1x2x32xf32>,
    %c1_70 = arith.constant 1 : index
    %c0_71 = arith.constant 0 : index
    %c0_72 = arith.constant 0 : index
    %282 = vector.load %arg0[%c1_70, %c0_71, %c0_72] : memref<2x16x32xf32, #tpu.memory_space<vmem>>, vector<1x16x32xf32>
    %283 = vector.shape_cast %282 : vector<1x16x32xf32> to vector<16x32xf32>
    %c1_73 = arith.constant 1 : index
    %c0_74 = arith.constant 0 : index
    %c0_75 = arith.constant 0 : index
    %284 = vector.load %arg1[%c1_73, %c0_74, %c0_75] : memref<2x16x16xf32, #tpu.memory_space<vmem>>, vector<1x16x16xf32>
    %285 = vector.shape_cast %284 : vector<1x16x16xf32> to vector<16x16xf32>
    %c1_76 = arith.constant 1 : index
    %c0_77 = arith.constant 0 : index
    %c0_78 = arith.constant 0 : index
    %c0_79 = arith.constant 0 : index
    %286 = vector.load %arg2[%c1_76, %c0_77, %c0_78, %c0_79] : memref<2x2x40x256xbf16, #tpu.memory_space<vmem>>, vector<1x1x40x256xbf16>
    %287 = vector.shape_cast %286 : vector<1x1x40x256xbf16> to vector<40x256xbf16>
    %288 = vector.extract_strided_slice %287 {offsets = [0, 0], sizes = [32, 96], strides = [1, 1]} : vector<40x256xbf16> to vector<32x96xbf16>
    %289 = vector.extract_strided_slice %287 {offsets = [0, 96], sizes = [32, 32], strides = [1, 1]} : vector<40x256xbf16> to vector<32x32xbf16>
    %290 = vector.extract_strided_slice %287 {offsets = [0, 128], sizes = [32, 64], strides = [1, 1]} : vector<40x256xbf16> to vector<32x64xbf16>
    %291 = vector.extract_strided_slice %287 {offsets = [0, 192], sizes = [32, 64], strides = [1, 1]} : vector<40x256xbf16> to vector<32x64xbf16>
    %292 = vector.extract_strided_slice %287 {offsets = [32, 0], sizes = [8, 96], strides = [1, 1]} : vector<40x256xbf16> to vector<8x96xbf16>
    %293 = arith.extf %292 : vector<8x96xbf16> to vector<8x96xf32>
    %294 = vector.extract_strided_slice %293 {offsets = [0, 0], sizes = [1, 96], strides = [1, 1]} : vector<8x96xf32> to vector<1x96xf32>
    %295 = vector.extract_strided_slice %293 {offsets = [1, 0], sizes = [1, 32], strides = [1, 1]} : vector<8x96xf32> to vector<1x32xf32>
    %296 = vector.extract_strided_slice %293 {offsets = [2, 0], sizes = [1, 32], strides = [1, 1]} : vector<8x96xf32> to vector<1x32xf32>
    %297 = vector.extract_strided_slice %293 {offsets = [3, 0], sizes = [1, 32], strides = [1, 1]} : vector<8x96xf32> to vector<1x32xf32>
    %298 = vector.extract_strided_slice %293 {offsets = [4, 0], sizes = [1, 64], strides = [1, 1]} : vector<8x96xf32> to vector<1x64xf32>
    %299 = vector.extract_strided_slice %293 {offsets = [5, 0], sizes = [1, 32], strides = [1, 1]} : vector<8x96xf32> to vector<1x32xf32>
    %300 = vector.extract_strided_slice %293 {offsets = [6, 0], sizes = [1, 32], strides = [1, 1]} : vector<8x96xf32> to vector<1x32xf32>
    %301 = vector.extract_strided_slice %293 {offsets = [7, 0], sizes = [1, 32], strides = [1, 1]} : vector<8x96xf32> to vector<1x32xf32>
    %302 = arith.truncf %283 : vector<16x32xf32> to vector<16x32xbf16>
    %cst_80 = arith.constant dense<0.000000e+00> : vector<16x96xf32>
    %303 = tpu.matmul %302, %288, %cst_80 {dimension_numbers = #tpu.dot_dimension_numbers<[1], [0], [0], [1], [0, 0, 1, 1], [], []>} : vector<16x32xbf16>, vector<32x96xbf16>, vector<16x96xf32> -> vector<16x96xf32>
    %304 = vector.broadcast %294 : vector<1x96xf32> to vector<16x96xf32>
    %305 = arith.addf %303, %304 : vector<16x96xf32>
    %306 = vector.extract_strided_slice %305 {offsets = [0, 0], sizes = [16, 16], strides = [1, 1]} : vector<16x96xf32> to vector<16x16xf32>
    %307 = arith.truncf %306 : vector<16x16xf32> to vector<16x16xbf16>
    %308 = vector.extract_strided_slice %305 {offsets = [0, 32], sizes = [16, 16], strides = [1, 1]} : vector<16x96xf32> to vector<16x16xf32>
    %309 = arith.truncf %308 : vector<16x16xf32> to vector<16x16xbf16>
    %310 = vector.extract_strided_slice %305 {offsets = [0, 64], sizes = [16, 16], strides = [1, 1]} : vector<16x96xf32> to vector<16x16xf32>
    %311 = arith.truncf %310 : vector<16x16xf32> to vector<16x16xbf16>
    %cst_81 = arith.constant dense<0.000000e+00> : vector<16x16xf32>
    %312 = tpu.matmul %307, %309, %cst_81 {dimension_numbers = #tpu.dot_dimension_numbers<[1], [1], [0], [0], [0, 0, 1, 0], [], []>} : vector<16x16xbf16>, vector<16x16xbf16>, vector<16x16xf32> -> vector<16x16xf32>
    %cst_82 = arith.constant 2.500000e-01 : f32
    %313 = vector.broadcast %cst_82 : f32 to vector<16x16xf32>
    %314 = arith.mulf %312, %313 : vector<16x16xf32>
    %315 = arith.addf %314, %285 : vector<16x16xf32>
    %cst_83 = arith.constant dense<0xFF800000> : vector<16xf32>
    %316 = vector.multi_reduction <maximumf>, %315, %cst_83 [1] : vector<16x16xf32> to vector<16xf32>
    %317 = vector.shape_cast %316 : vector<16xf32> to vector<16x1xf32>
    %318 = vector.broadcast %317 : vector<16x1xf32> to vector<16x16xf32>
    %319 = arith.subf %315, %318 : vector<16x16xf32>
    %320 = math.exp %319 : vector<16x16xf32>
    %cst_84 = arith.constant dense<0.000000e+00> : vector<16xf32>
    %321 = vector.multi_reduction <add>, %320, %cst_84 [1] : vector<16x16xf32> to vector<16xf32>
    %322 = vector.shape_cast %321 : vector<16xf32> to vector<16x1xf32>
    %323 = tpu.reciprocal %322 {approx = true} : vector<16x1xf32> -> vector<16x1xf32>
    %324 = vector.broadcast %323 : vector<16x1xf32> to vector<16x16xf32>
    %325 = arith.mulf %320, %324 : vector<16x16xf32>
    %326 = arith.truncf %325 : vector<16x16xf32> to vector<16x16xbf16>
    %cst_85 = arith.constant dense<0.000000e+00> : vector<16x16xf32>
    %327 = tpu.matmul %326, %311, %cst_85 {dimension_numbers = #tpu.dot_dimension_numbers<[1], [0], [0], [1], [0, 0, 1, 1], [], []>} : vector<16x16xbf16>, vector<16x16xbf16>, vector<16x16xf32> -> vector<16x16xf32>
    %328 = vector.extract_strided_slice %305 {offsets = [0, 16], sizes = [16, 16], strides = [1, 1]} : vector<16x96xf32> to vector<16x16xf32>
    %329 = arith.truncf %328 : vector<16x16xf32> to vector<16x16xbf16>
    %330 = vector.extract_strided_slice %305 {offsets = [0, 48], sizes = [16, 16], strides = [1, 1]} : vector<16x96xf32> to vector<16x16xf32>
    %331 = arith.truncf %330 : vector<16x16xf32> to vector<16x16xbf16>
    %332 = vector.extract_strided_slice %305 {offsets = [0, 80], sizes = [16, 16], strides = [1, 1]} : vector<16x96xf32> to vector<16x16xf32>
    %333 = arith.truncf %332 : vector<16x16xf32> to vector<16x16xbf16>
    %cst_86 = arith.constant dense<0.000000e+00> : vector<16x16xf32>
    %334 = tpu.matmul %329, %331, %cst_86 {dimension_numbers = #tpu.dot_dimension_numbers<[1], [1], [0], [0], [0, 0, 1, 0], [], []>} : vector<16x16xbf16>, vector<16x16xbf16>, vector<16x16xf32> -> vector<16x16xf32>
    %cst_87 = arith.constant 2.500000e-01 : f32
    %335 = vector.broadcast %cst_87 : f32 to vector<16x16xf32>
    %336 = arith.mulf %334, %335 : vector<16x16xf32>
    %337 = arith.addf %336, %285 : vector<16x16xf32>
    %cst_88 = arith.constant dense<0xFF800000> : vector<16xf32>
    %338 = vector.multi_reduction <maximumf>, %337, %cst_88 [1] : vector<16x16xf32> to vector<16xf32>
    %339 = vector.shape_cast %338 : vector<16xf32> to vector<16x1xf32>
    %340 = vector.broadcast %339 : vector<16x1xf32> to vector<16x16xf32>
    %341 = arith.subf %337, %340 : vector<16x16xf32>
    %342 = math.exp %341 : vector<16x16xf32>
    %cst_89 = arith.constant dense<0.000000e+00> : vector<16xf32>
    %343 = vector.multi_reduction <add>, %342, %cst_89 [1] : vector<16x16xf32> to vector<16xf32>
    %344 = vector.shape_cast %343 : vector<16xf32> to vector<16x1xf32>
    %345 = tpu.reciprocal %344 {approx = true} : vector<16x1xf32> -> vector<16x1xf32>
    %346 = vector.broadcast %345 : vector<16x1xf32> to vector<16x16xf32>
    %347 = arith.mulf %342, %346 : vector<16x16xf32>
    %348 = arith.truncf %347 : vector<16x16xf32> to vector<16x16xbf16>
    %cst_90 = arith.constant dense<0.000000e+00> : vector<16x16xf32>
    %349 = tpu.matmul %348, %333, %cst_90 {dimension_numbers = #tpu.dot_dimension_numbers<[1], [0], [0], [1], [0, 0, 1, 1], [], []>} : vector<16x16xbf16>, vector<16x16xbf16>, vector<16x16xf32> -> vector<16x16xf32>
    %350 = tpu.concatenate %327, %349 in 1 : vector<16x16xf32>, vector<16x16xf32> -> vector<16x32xf32>
    %351 = arith.truncf %350 : vector<16x32xf32> to vector<16x32xbf16>
    %cst_91 = arith.constant dense<0.000000e+00> : vector<16x32xf32>
    %352 = tpu.matmul %351, %289, %cst_91 {dimension_numbers = #tpu.dot_dimension_numbers<[1], [0], [0], [1], [0, 0, 1, 1], [], []>} : vector<16x32xbf16>, vector<32x32xbf16>, vector<16x32xf32> -> vector<16x32xf32>
    %353 = vector.broadcast %295 : vector<1x32xf32> to vector<16x32xf32>
    %354 = arith.addf %352, %353 : vector<16x32xf32>
    %355 = arith.addf %283, %354 : vector<16x32xf32>
    %cst_92 = arith.constant dense<0.000000e+00> : vector<16xf32>
    %356 = vector.multi_reduction <add>, %355, %cst_92 [1] : vector<16x32xf32> to vector<16xf32>
    %357 = vector.shape_cast %356 : vector<16xf32> to vector<16x1xf32>
    %cst_93 = arith.constant 3.200000e+01 : f32
    %358 = vector.broadcast %cst_93 : f32 to vector<16x1xf32>
    %359 = arith.divf %357, %358 : vector<16x1xf32>
    %360 = vector.broadcast %359 : vector<16x1xf32> to vector<16x32xf32>
    %361 = arith.subf %355, %360 : vector<16x32xf32>
    %362 = arith.mulf %361, %361 : vector<16x32xf32>
    %cst_94 = arith.constant dense<0.000000e+00> : vector<16xf32>
    %363 = vector.multi_reduction <add>, %362, %cst_94 [1] : vector<16x32xf32> to vector<16xf32>
    %364 = vector.shape_cast %363 : vector<16xf32> to vector<16x1xf32>
    %cst_95 = arith.constant 3.200000e+01 : f32
    %365 = vector.broadcast %cst_95 : f32 to vector<16x1xf32>
    %366 = arith.divf %364, %365 : vector<16x1xf32>
    %367 = vector.broadcast %359 : vector<16x1xf32> to vector<16x32xf32>
    %368 = arith.subf %355, %367 : vector<16x32xf32>
    %cst_96 = arith.constant 9.99999996E-13 : f32
    %369 = vector.broadcast %cst_96 : f32 to vector<16x1xf32>
    %370 = arith.addf %366, %369 : vector<16x1xf32>
    %371 = math.rsqrt %370 : vector<16x1xf32>
    %372 = vector.broadcast %371 : vector<16x1xf32> to vector<16x32xf32>
    %373 = arith.mulf %368, %372 : vector<16x32xf32>
    %374 = vector.broadcast %296 : vector<1x32xf32> to vector<16x32xf32>
    %375 = arith.mulf %373, %374 : vector<16x32xf32>
    %376 = vector.broadcast %297 : vector<1x32xf32> to vector<16x32xf32>
    %377 = arith.addf %375, %376 : vector<16x32xf32>
    %378 = arith.truncf %377 : vector<16x32xf32> to vector<16x32xbf16>
    %cst_97 = arith.constant dense<0.000000e+00> : vector<16x64xf32>
    %379 = tpu.matmul %378, %290, %cst_97 {dimension_numbers = #tpu.dot_dimension_numbers<[1], [0], [0], [1], [0, 0, 1, 1], [], []>} : vector<16x32xbf16>, vector<32x64xbf16>, vector<16x64xf32> -> vector<16x64xf32>
    %380 = vector.broadcast %298 : vector<1x64xf32> to vector<16x64xf32>
    %381 = arith.addf %379, %380 : vector<16x64xf32>
    %cst_98 = arith.constant 5.000000e-01 : f32
    %382 = vector.broadcast %cst_98 : f32 to vector<16x64xf32>
    %383 = arith.mulf %382, %381 : vector<16x64xf32>
    %cst_99 = arith.constant 4.471500e-02 : f32
    %384 = vector.broadcast %cst_99 : f32 to vector<16x64xf32>
    %385 = arith.mulf %384, %381 : vector<16x64xf32>
    %386 = arith.mulf %385, %381 : vector<16x64xf32>
    %387 = arith.mulf %386, %381 : vector<16x64xf32>
    %388 = arith.addf %381, %387 : vector<16x64xf32>
    %cst_100 = arith.constant 0.797884583 : f32
    %389 = vector.broadcast %cst_100 : f32 to vector<16x64xf32>
    %390 = arith.mulf %389, %388 : vector<16x64xf32>
    %391 = math.tanh %390 : vector<16x64xf32>
    %cst_101 = arith.constant 1.000000e+00 : f32
    %392 = vector.broadcast %cst_101 : f32 to vector<16x64xf32>
    %393 = arith.addf %392, %391 : vector<16x64xf32>
    %394 = arith.mulf %383, %393 : vector<16x64xf32>
    %395 = arith.truncf %394 : vector<16x64xf32> to vector<16x64xbf16>
    %cst_102 = arith.constant dense<0.000000e+00> : vector<16x32xf32>
    %396 = tpu.matmul %395, %291, %cst_102 {dimension_numbers = #tpu.dot_dimension_numbers<[1], [1], [0], [0], [0, 0, 1, 0], [], []>} : vector<16x64xbf16>, vector<32x64xbf16>, vector<16x32xf32> -> vector<16x32xf32>
    %397 = vector.broadcast %299 : vector<1x32xf32> to vector<16x32xf32>
    %398 = arith.addf %396, %397 : vector<16x32xf32>
    %399 = arith.addf %377, %398 : vector<16x32xf32>
    %cst_103 = arith.constant dense<0.000000e+00> : vector<16xf32>
    %400 = vector.multi_reduction <add>, %399, %cst_103 [1] : vector<16x32xf32> to vector<16xf32>
    %401 = vector.shape_cast %400 : vector<16xf32> to vector<16x1xf32>
    %cst_104 = arith.constant 3.200000e+01 : f32
    %402 = vector.broadcast %cst_104 : f32 to vector<16x1xf32>
    %403 = arith.divf %401, %402 : vector<16x1xf32>
    %404 = vector.broadcast %403 : vector<16x1xf32> to vector<16x32xf32>
    %405 = arith.subf %399, %404 : vector<16x32xf32>
    %406 = arith.mulf %405, %405 : vector<16x32xf32>
    %cst_105 = arith.constant dense<0.000000e+00> : vector<16xf32>
    %407 = vector.multi_reduction <add>, %406, %cst_105 [1] : vector<16x32xf32> to vector<16xf32>
    %408 = vector.shape_cast %407 : vector<16xf32> to vector<16x1xf32>
    %cst_106 = arith.constant 3.200000e+01 : f32
    %409 = vector.broadcast %cst_106 : f32 to vector<16x1xf32>
    %410 = arith.divf %408, %409 : vector<16x1xf32>
    %411 = vector.broadcast %403 : vector<16x1xf32> to vector<16x32xf32>
    %412 = arith.subf %399, %411 : vector<16x32xf32>
    %cst_107 = arith.constant 9.99999996E-13 : f32
    %413 = vector.broadcast %cst_107 : f32 to vector<16x1xf32>
    %414 = arith.addf %410, %413 : vector<16x1xf32>
    %415 = math.rsqrt %414 : vector<16x1xf32>
    %416 = vector.broadcast %415 : vector<16x1xf32> to vector<16x32xf32>
    %417 = arith.mulf %412, %416 : vector<16x32xf32>
    %418 = vector.broadcast %300 : vector<1x32xf32> to vector<16x32xf32>
    %419 = arith.mulf %417, %418 : vector<16x32xf32>
    %420 = vector.broadcast %301 : vector<1x32xf32> to vector<16x32xf32>
    %421 = arith.addf %419, %420 : vector<16x32xf32>
    %c1_108 = arith.constant 1 : index
    %c1_109 = arith.constant 1 : index
    %c0_110 = arith.constant 0 : index
    %c0_111 = arith.constant 0 : index
    %422 = vector.load %arg2[%c1_108, %c1_109, %c0_110, %c0_111] : memref<2x2x40x256xbf16, #tpu.memory_space<vmem>>, vector<1x1x40x256xbf16>
    %423 = vector.shape_cast %422 : vector<1x1x40x256xbf16> to vector<40x256xbf16>
    %424 = vector.extract_strided_slice %423 {offsets = [0, 0], sizes = [32, 96], strides = [1, 1]} : vector<40x256xbf16> to vector<32x96xbf16>
    %425 = vector.extract_strided_slice %423 {offsets = [0, 96], sizes = [32, 32], strides = [1, 1]} : vector<40x256xbf16> to vector<32x32xbf16>
    %426 = vector.extract_strided_slice %423 {offsets = [0, 128], sizes = [32, 64], strides = [1, 1]} : vector<40x256xbf16> to vector<32x64xbf16>
    %427 = vector.extract_strided_slice %423 {offsets = [0, 192], sizes = [32, 64], strides = [1, 1]} : vector<40x256xbf16> to vector<32x64xbf16>
    %428 = vector.extract_strided_slice %423 {offsets = [32, 0], sizes = [8, 96], strides = [1, 1]} : vector<40x256xbf16> to vector<8x96xbf16>
    %429 = arith.extf %428 : vector<8x96xbf16> to vector<8x96xf32>
    %430 = vector.extract_strided_slice %429 {offsets = [0, 0], sizes = [1, 96], strides = [1, 1]} : vector<8x96xf32> to vector<1x96xf32>
    %431 = vector.extract_strided_slice %429 {offsets = [1, 0], sizes = [1, 32], strides = [1, 1]} : vector<8x96xf32> to vector<1x32xf32>
    %432 = vector.extract_strided_slice %429 {offsets = [2, 0], sizes = [1, 32], strides = [1, 1]} : vector<8x96xf32> to vector<1x32xf32>
    %433 = vector.extract_strided_slice %429 {offsets = [3, 0], sizes = [1, 32], strides = [1, 1]} : vector<8x96xf32> to vector<1x32xf32>
    %434 = vector.extract_strided_slice %429 {offsets = [4, 0], sizes = [1, 64], strides = [1, 1]} : vector<8x96xf32> to vector<1x64xf32>
    %435 = vector.extract_strided_slice %429 {offsets = [5, 0], sizes = [1, 32], strides = [1, 1]} : vector<8x96xf32> to vector<1x32xf32>
    %436 = vector.extract_strided_slice %429 {offsets = [6, 0], sizes = [1, 32], strides = [1, 1]} : vector<8x96xf32> to vector<1x32xf32>
    %437 = vector.extract_strided_slice %429 {offsets = [7, 0], sizes = [1, 32], strides = [1, 1]} : vector<8x96xf32> to vector<1x32xf32>
    %438 = arith.truncf %421 : vector<16x32xf32> to vector<16x32xbf16>
    %cst_112 = arith.constant dense<0.000000e+00> : vector<16x96xf32>
    %439 = tpu.matmul %438, %424, %cst_112 {dimension_numbers = #tpu.dot_dimension_numbers<[1], [0], [0], [1], [0, 0, 1, 1], [], []>} : vector<16x32xbf16>, vector<32x96xbf16>, vector<16x96xf32> -> vector<16x96xf32>
    %440 = vector.broadcast %430 : vector<1x96xf32> to vector<16x96xf32>
    %441 = arith.addf %439, %440 : vector<16x96xf32>
    %442 = vector.extract_strided_slice %441 {offsets = [0, 0], sizes = [16, 16], strides = [1, 1]} : vector<16x96xf32> to vector<16x16xf32>
    %443 = arith.truncf %442 : vector<16x16xf32> to vector<16x16xbf16>
    %444 = vector.extract_strided_slice %441 {offsets = [0, 32], sizes = [16, 16], strides = [1, 1]} : vector<16x96xf32> to vector<16x16xf32>
    %445 = arith.truncf %444 : vector<16x16xf32> to vector<16x16xbf16>
    %446 = vector.extract_strided_slice %441 {offsets = [0, 64], sizes = [16, 16], strides = [1, 1]} : vector<16x96xf32> to vector<16x16xf32>
    %447 = arith.truncf %446 : vector<16x16xf32> to vector<16x16xbf16>
    %cst_113 = arith.constant dense<0.000000e+00> : vector<16x16xf32>
    %448 = tpu.matmul %443, %445, %cst_113 {dimension_numbers = #tpu.dot_dimension_numbers<[1], [1], [0], [0], [0, 0, 1, 0], [], []>} : vector<16x16xbf16>, vector<16x16xbf16>, vector<16x16xf32> -> vector<16x16xf32>
    %cst_114 = arith.constant 2.500000e-01 : f32
    %449 = vector.broadcast %cst_114 : f32 to vector<16x16xf32>
    %450 = arith.mulf %448, %449 : vector<16x16xf32>
    %451 = arith.addf %450, %285 : vector<16x16xf32>
    %cst_115 = arith.constant dense<0xFF800000> : vector<16xf32>
    %452 = vector.multi_reduction <maximumf>, %451, %cst_115 [1] : vector<16x16xf32> to vector<16xf32>
    %453 = vector.shape_cast %452 : vector<16xf32> to vector<16x1xf32>
    %454 = vector.broadcast %453 : vector<16x1xf32> to vector<16x16xf32>
    %455 = arith.subf %451, %454 : vector<16x16xf32>
    %456 = math.exp %455 : vector<16x16xf32>
    %cst_116 = arith.constant dense<0.000000e+00> : vector<16xf32>
    %457 = vector.multi_reduction <add>, %456, %cst_116 [1] : vector<16x16xf32> to vector<16xf32>
    %458 = vector.shape_cast %457 : vector<16xf32> to vector<16x1xf32>
    %459 = tpu.reciprocal %458 {approx = true} : vector<16x1xf32> -> vector<16x1xf32>
    %460 = vector.broadcast %459 : vector<16x1xf32> to vector<16x16xf32>
    %461 = arith.mulf %456, %460 : vector<16x16xf32>
    %462 = arith.truncf %461 : vector<16x16xf32> to vector<16x16xbf16>
    %cst_117 = arith.constant dense<0.000000e+00> : vector<16x16xf32>
    %463 = tpu.matmul %462, %447, %cst_117 {dimension_numbers = #tpu.dot_dimension_numbers<[1], [0], [0], [1], [0, 0, 1, 1], [], []>} : vector<16x16xbf16>, vector<16x16xbf16>, vector<16x16xf32> -> vector<16x16xf32>
    %464 = vector.extract_strided_slice %441 {offsets = [0, 16], sizes = [16, 16], strides = [1, 1]} : vector<16x96xf32> to vector<16x16xf32>
    %465 = arith.truncf %464 : vector<16x16xf32> to vector<16x16xbf16>
    %466 = vector.extract_strided_slice %441 {offsets = [0, 48], sizes = [16, 16], strides = [1, 1]} : vector<16x96xf32> to vector<16x16xf32>
    %467 = arith.truncf %466 : vector<16x16xf32> to vector<16x16xbf16>
    %468 = vector.extract_strided_slice %441 {offsets = [0, 80], sizes = [16, 16], strides = [1, 1]} : vector<16x96xf32> to vector<16x16xf32>
    %469 = arith.truncf %468 : vector<16x16xf32> to vector<16x16xbf16>
    %cst_118 = arith.constant dense<0.000000e+00> : vector<16x16xf32>
    %470 = tpu.matmul %465, %467, %cst_118 {dimension_numbers = #tpu.dot_dimension_numbers<[1], [1], [0], [0], [0, 0, 1, 0], [], []>} : vector<16x16xbf16>, vector<16x16xbf16>, vector<16x16xf32> -> vector<16x16xf32>
    %cst_119 = arith.constant 2.500000e-01 : f32
    %471 = vector.broadcast %cst_119 : f32 to vector<16x16xf32>
    %472 = arith.mulf %470, %471 : vector<16x16xf32>
    %473 = arith.addf %472, %285 : vector<16x16xf32>
    %cst_120 = arith.constant dense<0xFF800000> : vector<16xf32>
    %474 = vector.multi_reduction <maximumf>, %473, %cst_120 [1] : vector<16x16xf32> to vector<16xf32>
    %475 = vector.shape_cast %474 : vector<16xf32> to vector<16x1xf32>
    %476 = vector.broadcast %475 : vector<16x1xf32> to vector<16x16xf32>
    %477 = arith.subf %473, %476 : vector<16x16xf32>
    %478 = math.exp %477 : vector<16x16xf32>
    %cst_121 = arith.constant dense<0.000000e+00> : vector<16xf32>
    %479 = vector.multi_reduction <add>, %478, %cst_121 [1] : vector<16x16xf32> to vector<16xf32>
    %480 = vector.shape_cast %479 : vector<16xf32> to vector<16x1xf32>
    %481 = tpu.reciprocal %480 {approx = true} : vector<16x1xf32> -> vector<16x1xf32>
    %482 = vector.broadcast %481 : vector<16x1xf32> to vector<16x16xf32>
    %483 = arith.mulf %478, %482 : vector<16x16xf32>
    %484 = arith.truncf %483 : vector<16x16xf32> to vector<16x16xbf16>
    %cst_122 = arith.constant dense<0.000000e+00> : vector<16x16xf32>
    %485 = tpu.matmul %484, %469, %cst_122 {dimension_numbers = #tpu.dot_dimension_numbers<[1], [0], [0], [1], [0, 0, 1, 1], [], []>} : vector<16x16xbf16>, vector<16x16xbf16>, vector<16x16xf32> -> vector<16x16xf32>
    %486 = tpu.concatenate %463, %485 in 1 : vector<16x16xf32>, vector<16x16xf32> -> vector<16x32xf32>
    %487 = arith.truncf %486 : vector<16x32xf32> to vector<16x32xbf16>
    %cst_123 = arith.constant dense<0.000000e+00> : vector<16x32xf32>
    %488 = tpu.matmul %487, %425, %cst_123 {dimension_numbers = #tpu.dot_dimension_numbers<[1], [0], [0], [1], [0, 0, 1, 1], [], []>} : vector<16x32xbf16>, vector<32x32xbf16>, vector<16x32xf32> -> vector<16x32xf32>
    %489 = vector.broadcast %431 : vector<1x32xf32> to vector<16x32xf32>
    %490 = arith.addf %488, %489 : vector<16x32xf32>
    %491 = arith.addf %421, %490 : vector<16x32xf32>
    %cst_124 = arith.constant dense<0.000000e+00> : vector<16xf32>
    %492 = vector.multi_reduction <add>, %491, %cst_124 [1] : vector<16x32xf32> to vector<16xf32>
    %493 = vector.shape_cast %492 : vector<16xf32> to vector<16x1xf32>
    %cst_125 = arith.constant 3.200000e+01 : f32
    %494 = vector.broadcast %cst_125 : f32 to vector<16x1xf32>
    %495 = arith.divf %493, %494 : vector<16x1xf32>
    %496 = vector.broadcast %495 : vector<16x1xf32> to vector<16x32xf32>
    %497 = arith.subf %491, %496 : vector<16x32xf32>
    %498 = arith.mulf %497, %497 : vector<16x32xf32>
    %cst_126 = arith.constant dense<0.000000e+00> : vector<16xf32>
    %499 = vector.multi_reduction <add>, %498, %cst_126 [1] : vector<16x32xf32> to vector<16xf32>
    %500 = vector.shape_cast %499 : vector<16xf32> to vector<16x1xf32>
    %cst_127 = arith.constant 3.200000e+01 : f32
    %501 = vector.broadcast %cst_127 : f32 to vector<16x1xf32>
    %502 = arith.divf %500, %501 : vector<16x1xf32>
    %503 = vector.broadcast %495 : vector<16x1xf32> to vector<16x32xf32>
    %504 = arith.subf %491, %503 : vector<16x32xf32>
    %cst_128 = arith.constant 9.99999996E-13 : f32
    %505 = vector.broadcast %cst_128 : f32 to vector<16x1xf32>
    %506 = arith.addf %502, %505 : vector<16x1xf32>
    %507 = math.rsqrt %506 : vector<16x1xf32>
    %508 = vector.broadcast %507 : vector<16x1xf32> to vector<16x32xf32>
    %509 = arith.mulf %504, %508 : vector<16x32xf32>
    %510 = vector.broadcast %432 : vector<1x32xf32> to vector<16x32xf32>
    %511 = arith.mulf %509, %510 : vector<16x32xf32>
    %512 = vector.broadcast %433 : vector<1x32xf32> to vector<16x32xf32>
    %513 = arith.addf %511, %512 : vector<16x32xf32>
    %514 = arith.truncf %513 : vector<16x32xf32> to vector<16x32xbf16>
    %cst_129 = arith.constant dense<0.000000e+00> : vector<16x64xf32>
    %515 = tpu.matmul %514, %426, %cst_129 {dimension_numbers = #tpu.dot_dimension_numbers<[1], [0], [0], [1], [0, 0, 1, 1], [], []>} : vector<16x32xbf16>, vector<32x64xbf16>, vector<16x64xf32> -> vector<16x64xf32>
    %516 = vector.broadcast %434 : vector<1x64xf32> to vector<16x64xf32>
    %517 = arith.addf %515, %516 : vector<16x64xf32>
    %cst_130 = arith.constant 5.000000e-01 : f32
    %518 = vector.broadcast %cst_130 : f32 to vector<16x64xf32>
    %519 = arith.mulf %518, %517 : vector<16x64xf32>
    %cst_131 = arith.constant 4.471500e-02 : f32
    %520 = vector.broadcast %cst_131 : f32 to vector<16x64xf32>
    %521 = arith.mulf %520, %517 : vector<16x64xf32>
    %522 = arith.mulf %521, %517 : vector<16x64xf32>
    %523 = arith.mulf %522, %517 : vector<16x64xf32>
    %524 = arith.addf %517, %523 : vector<16x64xf32>
    %cst_132 = arith.constant 0.797884583 : f32
    %525 = vector.broadcast %cst_132 : f32 to vector<16x64xf32>
    %526 = arith.mulf %525, %524 : vector<16x64xf32>
    %527 = math.tanh %526 : vector<16x64xf32>
    %cst_133 = arith.constant 1.000000e+00 : f32
    %528 = vector.broadcast %cst_133 : f32 to vector<16x64xf32>
    %529 = arith.addf %528, %527 : vector<16x64xf32>
    %530 = arith.mulf %519, %529 : vector<16x64xf32>
    %531 = arith.truncf %530 : vector<16x64xf32> to vector<16x64xbf16>
    %cst_134 = arith.constant dense<0.000000e+00> : vector<16x32xf32>
    %532 = tpu.matmul %531, %427, %cst_134 {dimension_numbers = #tpu.dot_dimension_numbers<[1], [1], [0], [0], [0, 0, 1, 0], [], []>} : vector<16x64xbf16>, vector<32x64xbf16>, vector<16x32xf32> -> vector<16x32xf32>
    %533 = vector.broadcast %435 : vector<1x32xf32> to vector<16x32xf32>
    %534 = arith.addf %532, %533 : vector<16x32xf32>
    %535 = arith.addf %513, %534 : vector<16x32xf32>
    %cst_135 = arith.constant dense<0.000000e+00> : vector<16xf32>
    %536 = vector.multi_reduction <add>, %535, %cst_135 [1] : vector<16x32xf32> to vector<16xf32>
    %537 = vector.shape_cast %536 : vector<16xf32> to vector<16x1xf32>
    %cst_136 = arith.constant 3.200000e+01 : f32
    %538 = vector.broadcast %cst_136 : f32 to vector<16x1xf32>
    %539 = arith.divf %537, %538 : vector<16x1xf32>
    %540 = vector.broadcast %539 : vector<16x1xf32> to vector<16x32xf32>
    %541 = arith.subf %535, %540 : vector<16x32xf32>
    %542 = arith.mulf %541, %541 : vector<16x32xf32>
    %cst_137 = arith.constant dense<0.000000e+00> : vector<16xf32>
    %543 = vector.multi_reduction <add>, %542, %cst_137 [1] : vector<16x32xf32> to vector<16xf32>
    %544 = vector.shape_cast %543 : vector<16xf32> to vector<16x1xf32>
    %cst_138 = arith.constant 3.200000e+01 : f32
    %545 = vector.broadcast %cst_138 : f32 to vector<16x1xf32>
    %546 = arith.divf %544, %545 : vector<16x1xf32>
    %547 = vector.broadcast %539 : vector<16x1xf32> to vector<16x32xf32>
    %548 = arith.subf %535, %547 : vector<16x32xf32>
    %cst_139 = arith.constant 9.99999996E-13 : f32
    %549 = vector.broadcast %cst_139 : f32 to vector<16x1xf32>
    %550 = arith.addf %546, %549 : vector<16x1xf32>
    %551 = math.rsqrt %550 : vector<16x1xf32>
    %552 = vector.broadcast %551 : vector<16x1xf32> to vector<16x32xf32>
    %553 = arith.mulf %548, %552 : vector<16x32xf32>
    %554 = vector.broadcast %436 : vector<1x32xf32> to vector<16x32xf32>
    %555 = arith.mulf %553, %554 : vector<16x32xf32>
    %556 = vector.broadcast %437 : vector<1x32xf32> to vector<16x32xf32>
    %557 = arith.addf %555, %556 : vector<16x32xf32>
    %558 = vector.extract_strided_slice %557 {offsets = [0, 0], sizes = [1, 32], strides = [1, 1]} : vector<16x32xf32> to vector<1x32xf32>
    %559 = vector.extract_strided_slice %557 {offsets = [8, 0], sizes = [1, 32], strides = [1, 1]} : vector<16x32xf32> to vector<1x32xf32>
    %560 = tpu.concatenate %558, %559 in 0 : vector<1x32xf32>, vector<1x32xf32> -> vector<2x32xf32>
    %c1_140 = arith.constant 1 : index
    %c0_141 = arith.constant 0 : index
    %c0_142 = arith.constant 0 : index
    %561 = vector.load %arg3[%c1_140, %c0_141, %c0_142] : memref<2x2x32xf32, #tpu.memory_space<vmem>>, vector<1x2x32xf32>
    %562 = vector.shape_cast %561 : vector<1x2x32xf32> to vector<2x32xf32>
    %563 = vector.shape_cast %560 : vector<2x32xf32> to vector<1x2x32xf32>
    tpu.vector_store %arg3[%c1_140, %c0_141, %c0_142], %563 {strides = array<i32>} : memref<2x2x32xf32, #tpu.memory_space<vmem>>, vector<1x2x32xf32>,
    return
  }
}

</mosaic_0001>

<bundles_post_ra>
// kernel: dual_encoder_forward.1
= control target key start
LH: loop header
LB: loop body
LE: loop exit
PB: predicated region body
PF: predicated region fallthrough
CT: control target
= control target key end

     0   :  { %v2970_v0 = vmov 0.0   ;;  %vm2971_vm0 = vmmov 0   ;;  %vm42_vm1 = vcmask 261120   ;;  %v26_v6 = vlaneseq  ;;  %s2972_s22 = smov 112   ;;  %s2973_s23 = smov 96   ;;  %s3624_s2 = inlined_call_operand.vmem [shape: bf16[2,2,40,256], index: 2, kind: input, shape index: {}]   ;;  %s3625_s0 = inlined_call_operand.vmem [shape: f32[2,16,32], index: 0, kind: input, shape index: {}]   ;;  %s3626_s1 = inlined_call_operand.vmem [shape: f32[2,16,16], index: 1, kind: input, shape index: {}]   ;;  %s3627_s3 = inlined_call_operand.vmem [shape: f32[2,2,32], index: 3, kind: output, shape index: {}]  }
   0x1   :  { %2581 = vmatprep.subr.bf16.mxu1 %v2970_v0  ;;  %v3003_v1 = vld [vmem:[%s3624_s2] ss:$8 sps:$4 sm:$0xff]   ;;  %2585 = vmatprep.mubr.msk.bf16.mxu1 %vm2971_vm0, %v2970_v0  ;;  %v3014_v2 = vld [vmem:[%s3624_s2 + $0x10] ss:$8 sps:$4 sm:$0xff]   ;;  %s2974_s24 = smov 80   ;;  %vm91_vm2 = vcmask 130048  }
   0x2   :  { %2595 = vmatprep.subr.bf16.mxu0 %v2970_v0  ;;  %2597 = vmatprep.mubr.msk.bf16.mxu0 %vm2971_vm0, %v2970_v0  ;;  %v3019_v3 = vld [vmem:[%s3625_s0] sm:$0xff]  ;;  %v3025_v4 = vld [vmem:[%s3625_s0 + $0x8] sm:$0xff]  ;;  %v3034_v7 = vshrl.u32 %v26_v6, 7  ;;  %s2975_s29 = smov 48   ;;  %s2976_s30 = smov 64   ;;  %vm528_vm3 = vcmask 523264  }
   0x3   :  { %2582 = vmatpush3.bf16.msra.mxu1 %v3003_v1  ;;  %v25_v5 = vpack.c.bf16 %v3025_v4, %v3019_v3  ;;  %v23_v8 = vld [vmem:[%s3624_s2 + $0x20] sm:$0xf]  ;;  %v3073_v29 = vld [vmem:[%s3626_s1 + $0x8] sm:$0xff]  ;;  %s2977_s8 = smov 32   ;;  %s2978_s9 = smov 16   ;;  %vm1219_vm4 = vcmask 1040384  }
   0x4   :  { %2583 = vmatprep.subr.bf16.mxu1 %v2970_v0  ;;  %v3039_v9 = vunpack.c.l.bf16 %v23_v8  ;;  %v3042_v10 = vsub.s32 0, %v3034_v7  ;;  %v3068_v25 = vld [vmem:[%s3626_s1] sm:$0xff]  ;;  %vm1221_vm5 = vcmask 254976  }
   0x6   :  { %v29_v11 = vrot.slane %v3039_v9, %v3042_v10 }
   0x7   :  { %2584 = vmatpush3.bf16.msra.mxu1 %v3014_v2 }
   0x8   :  { %2589 = vmatprep.subr.bf16.mxu1 %v2970_v0 }
   0xa   :  { %2586 = vmatmul.mubr.msk.bf16.vlgmr.msra.gmra.mrb[0].mxu1 %vm42_vm1, %v25_v5 }
   0xb   :  { %2591 = vmatprep.mubr.msk.bf16.mxu1 %vm2971_vm0, %v2970_v0 }
  0xdd   :  { %v80_v12 = vpop.f32.mrb[0].mxu1 }
  0xde   :  { %v2587_v13 = vpop.f32.mrb[1].mxu1  ;;  %v81_v15 = vadd.f32 %v80_v12, %v29_v11 }
  0xdf   :  { %v83_v14 = vpop.f32.mrb[2].mxu1 }
  0xe0   :  { %v84_v16 = vadd.f32 %v83_v14, %v29_v11  ;;  %v2588_v17 = vpop.f32.mrb[3].mxu1 }
  0xe2   :  { %v3046_v18 = vpack.c.bf16 %v84_v16, %v81_v15 }
  0xe4   :  { %213 = vrot.lane.b32.xlu1 %v3046_v18, %s2972_s22  ;;  %89 = vrot.lane.b32.xlu0 %v3046_v18, %s2973_s23 }
  0xe8   :  { %215 = vrot.lane.b32.xlu0 %v3046_v18, %s2974_s24 }
 0x156   :  { %v90_v19 = vpop.permute.xlu0 %89  ;;  %v214_v23 = vpop.permute.xlu1 %213 }
 0x157   :  { %v96_v20 = vsel %vm91_vm2, %v90_v19, 0 }
 0x158   :  { %2590 = vmatpush3.bf16.xpose.msra.mxu1 %v96_v20 }
 0x159   :  { %2601 = vmatprep.subr.bf16.mxu1 %v2970_v0 }
 0x15a   :  { %v216_v21 = vpop.permute.xlu0 %215 }
 0x15b   :  { %v221_v22 = vsel %vm91_vm2, %v216_v21, 0 }
 0x15f   :  { %2592 = vmatmul.mubr.msk.bf16.vlgmr.msra.gmra.mrb[4].mxu1 %vm91_vm2, %v3046_v18 }
 0x160   :  { %2602 = vmatpush3.bf16.xpose.msra.mxu1 %v221_v22  ;;  %2603 = vmatprep.mubr.msk.bf16.mxu1 %vm2971_vm0, %v2970_v0 }
 0x161   :  { %2613 = vmatprep.subr.bf16.mxu1 %v2970_v0 }
 0x167   :  { %2604 = vmatmul.mubr.msk.bf16.vlgmr.msra.gmra.mrb[8].mxu1 %vm91_vm2, %v214_v23 }
 0x168   :  { %2617 = vmatprep.mubr.msk.bf16.mxu1 %vm2971_vm0, %v2970_v0 }
 0x232   :  { %v132_v24 = vpop.f32.mrb[4].mxu1 }
 0x233   :  { %v139_v26 = vmul.f32 0.25, %v132_v24  ;;  %v2593_v27 = vpop.f32.mrb[5].mxu1 }
 0x234   :  { %v135_v28 = vpop.f32.mrb[6].mxu1 }
 0x235   :  { %v140_v30 = vmul.f32 0.25, %v135_v28  ;;  %v2594_v31 = vpop.f32.mrb[7].mxu1  ;;  %v141_v32 = vadd.f32 %v139_v26, %v3068_v25  ;;  %v2836_v26 = vld [vmem:[%s3624_s2 + $0x4] ss:$8 sps:$4 sm:$0xff]   ;;  %v2839_v28 = vld [vmem:[%s3624_s2 + $0x14] ss:$8 sps:$4 sm:$0xff]  }
 0x237   :  { %v143_v33 = vsel %vm91_vm2, %v141_v32, -inf  ;;  %v142_v34 = vadd.f32 %v140_v30, %v3073_v29 }
 0x238   :  { %144 = vmax.xlane.f32.xlu1 %v143_v33 }
 0x239   :  { %v146_v35 = vsel %vm91_vm2, %v142_v34, -inf }
 0x23a   :  { %147 = vmax.xlane.f32.xlu0 %v146_v35  ;;  %v257_v36 = vpop.f32.mrb[8].mxu1 }
 0x23b   :  { %v264_v37 = vmul.f32 0.25, %v257_v36  ;;  %v2605_v38 = vpop.f32.mrb[9].mxu1 }
 0x23c   :  { %v260_v39 = vpop.f32.mrb[10].mxu1 }
 0x23d   :  { %v265_v40 = vmul.f32 0.25, %v260_v39  ;;  %v2606_v41 = vpop.f32.mrb[11].mxu1  ;;  %v266_v42 = vadd.f32 %v264_v37, %v3068_v25 }
 0x23f   :  { %v268_v43 = vsel %vm91_vm2, %v266_v42, -inf  ;;  %v267_v44 = vadd.f32 %v265_v40, %v3073_v29 }
 0x240   :  { %269 = vmax.xlane.f32.xlu0 %v268_v43 }
 0x241   :  { %v271_v45 = vsel %vm91_vm2, %v267_v44, -inf }
 0x242   :  { %272 = vmax.xlane.f32.xlu1 %v271_v45  ;;  %v3120_v45 = vsub.s32 1, %v3034_v7 }
 0x2c5   :  { %v145_v46 = vpop.xlane.xlu1 %144 }
 0x2c6   :  { %v149_v47 = vsub.f32 %v141_v32, %v145_v46  ;;  %v352_v46 = vrot.slane %v3039_v9, %v3120_v45 }
 0x2c7   :  { %v148_v48 = vpop.xlane.xlu0 %147 }
 0x2c8   :  { %v151_v49 = vmul.f32 1.442695, %v149_v47  ;;  %v150_v50 = vsub.f32 %v142_v34, %v148_v48 }
 0x2ca   :  { %2858 = vpow2.f32 %v151_v49  ;;  %v153_v51 = vmul.f32 1.442695, %v150_v50 }
 0x2cc   :  { %2860 = vpow2.f32 %v153_v51 }
 0x2cd   :  { %v270_v52 = vpop.xlane.xlu0 %269 }
 0x2ce   :  { %v274_v53 = vsub.f32 %v266_v42, %v270_v52 }
 0x2cf   :  { %v273_v54 = vpop.xlane.xlu1 %272 }
 0x2d0   :  { %v276_v55 = vmul.f32 1.442695, %v274_v53  ;;  %v275_v56 = vsub.f32 %v267_v44, %v273_v54 }
 0x2d2   :  { %2862 = vpow2.f32 %v276_v55  ;;  %v278_v57 = vmul.f32 1.442695, %v275_v56 }
 0x2d4   :  { %v2859_v58 = vpop.eup %2858  ;;  %2864 = vpow2.f32 %v278_v57 }
 0x2d5   :  { %v155_v59 = vsel %vm91_vm2, %v2859_v58, 0.0 }
 0x2d6   :  { %v2861_v60 = vpop.eup %2860  ;;  %156 = vadd.xlane.f32.xlu0 %v155_v59 }
 0x2d7   :  { %v158_v61 = vsel %vm91_vm2, %v2861_v60, 0.0 }
 0x2d8   :  { %159 = vadd.xlane.f32.xlu1 %v158_v61 }
 0x2dc   :  { %v2863_v62 = vpop.eup %2862 }
 0x2dd   :  { %v280_v63 = vsel %vm91_vm2, %v2863_v62, 0.0 }
 0x2de   :  { %v2865_v5 = vpop.eup %2864  ;;  %281 = vadd.xlane.f32.xlu0 %v280_v63 }
 0x2df   :  { %v283_v6 = vsel %vm91_vm2, %v2865_v5, 0.0 }
 0x2e0   :  { %284 = vadd.xlane.f32.xlu1 %v283_v6 }
 0x2f1   :  { %291 = vrot.lane.b32.xlu1 %v3046_v18, %s2975_s29 }
 0x2f4   :  { %166 = vrot.lane.b32.xlu0 %v3046_v18, %s2976_s30 }
 0x2f5   :  { %353 = vrot.lane.b32.xlu1 %v3003_v1, %s2977_s8 }
 0x2f9   :  { %355 = vrot.lane.b32.xlu1 %v3014_v2, %s2977_s8 }
 0x363   :  { %v157_v8 = vpop.xlane.xlu0 %156 }
 0x364   :  { %2866 = vrcp.f32 %v157_v8 }
 0x365   :  { %v160_v11 = vpop.xlane.xlu1 %159 }
 0x366   :  { %2868 = vrcp.f32 %v160_v11 }
 0x36b   :  { %v282_v12 = vpop.xlane.xlu0 %281 }
 0x36c   :  { %2870 = vrcp.f32 %v282_v12 }
 0x36d   :  { %v285_v13 = vpop.xlane.xlu1 %284 }
 0x36e   :  { %v2867_v14 = vpop.eup %2866  ;;  %2872 = vrcp.f32 %v285_v13 }
 0x36f   :  { %v167_v15 = vpop.permute.xlu0 %166  ;;  %v163_v17 = vmul.f32 %v2867_v14, %v2859_v58 }
 0x370   :  { %v2869_v16 = vpop.eup %2868  ;;  %2596 = vmatpush3.bf16.msra.mxu0 %v167_v15  ;;  %v3133_v15 = vsub.s32 2, %v3034_v7 }
 0x371   :  { %2607 = vmatprep.subr.bf16.mxu0 %v2970_v0  ;;  %v164_v19 = vmul.f32 %v2869_v16, %v2861_v60  ;;  %v292_v21 = vpop.permute.xlu1 %291 }
 0x373   :  { %v165_v20 = vpack.c.bf16 %v164_v19, %v163_v17  ;;  %v435_v17 = vrot.slane %v3039_v9, %v3133_v15 }
 0x375   :  { %2598 = vmatmul.mubr.msk.bf16.vlgmr.msra.gmra.mrb[0].mxu0 %vm91_vm2, %v165_v20  ;;  %v354_v30 = vpop.permute.xlu1 %353  ;;  %v3138_v20 = vsub.s32 3, %v3034_v7 }
 0x376   :  { %v2871_v18 = vpop.eup %2870  ;;  %2608 = vmatpush3.bf16.msra.mxu0 %v292_v21  ;;  %2609 = vmatprep.mubr.msk.bf16.mxu0 %vm2971_vm0, %v2970_v0 }
 0x377   :  { %2621 = vmatprep.subr.bf16.mxu0 %v2970_v0  ;;  %v288_v23 = vmul.f32 %v2871_v18, %v2863_v62  ;;  %2614 = vmatpush3.bf16.msra.mxu1 %v354_v30 }
 0x378   :  { %v2873_v22 = vpop.eup %2872  ;;  %2615 = vmatprep.subr.bf16.mxu1 %v2970_v0 }
 0x379   :  { %v289_v24 = vmul.f32 %v2873_v22, %v2865_v5  ;;  %v356_v34 = vpop.permute.xlu1 %355 }
 0x37b   :  { %v290_v27 = vpack.c.bf16 %v289_v24, %v288_v23  ;;  %2616 = vmatpush3.bf16.msra.mxu1 %v356_v34  ;;  %v441_v23 = vrot.slane %v3039_v9, %v3138_v20  ;;  %v3150_v34 = vsub.s32 4, %v3034_v7 }
 0x37c   :  { %2629 = vmatprep.subr.bf16.mxu1 %v2970_v0 }
 0x37d   :  { %2610 = vmatmul.mubr.msk.bf16.vlgmr.msra.gmra.mrb[4].mxu0 %vm91_vm2, %v290_v27 }
 0x37e   :  { %2622 = vmatpush3.bf16.msra.mxu0 %v2836_v26  ;;  %2625 = vmatprep.mubr.msk.bf16.mxu0 %vm2971_vm0, %v2970_v0 }
 0x37f   :  { %2623 = vmatprep.subr.bf16.mxu0 %v2970_v0 }
 0x382   :  { %2624 = vmatpush3.bf16.msra.mxu0 %v2839_v28 }
 0x383   :  { %2637 = vmatprep.subr.bf16.mxu0 %v2970_v0 }
 0x448   :  { %v206_v31 = vpop.f32.mrb[0].mxu0 }
 0x449   :  { %v2599_v32 = vpop.f32.mrb[1].mxu0 }
 0x44a   :  { %v209_v33 = vpop.f32.mrb[2].mxu0 }
 0x44b   :  { %v2600_v35 = vpop.f32.mrb[3].mxu0 }
 0x44c   :  { %v448_v35 = vrot.slane %v3039_v9, %v3150_v34 }
 0x450   :  { %v331_v36 = vpop.f32.mrb[4].mxu0 }
 0x451   :  { %v2611_v37 = vpop.f32.mrb[5].mxu0 }
 0x452   :  { %v334_v38 = vpop.f32.mrb[6].mxu0 }
 0x453   :  { %v2814_v39 = vpack.i.bf16 %v334_v38, %v331_v36  ;;  %v2612_v1 = vpop.f32.mrb[7].mxu0 }
 0x455   :  { %2815 = vrot.lane.b32.xlu0 %v2814_v39, %s2978_s9 }
 0x4c7   :  { %v2816_v2 = vpop.permute.xlu0 %2815 }
 0x4c8   :  { %v2818_v40 = vunpack.i.h.bf16 %v2816_v2  ;;  %v2817_v41 = vunpack.i.l.bf16 %v2816_v2 }
 0x4ca   :  { %v347_v42 = vsel %vm91_vm2, %v209_v33, %v2818_v40  ;;  %v346_v43 = vsel %vm91_vm2, %v206_v31, %v2817_v41 }
 0x4cb   :  { %v348_v44 = vpack.c.bf16 %v347_v42, %v346_v43 }
 0x4cd   :  { %2618 = vmatmul.mubr.msk.bf16.vlgmr.msra.gmra.mrb[12].mxu1 %vm42_vm1, %v348_v44 }
 0x4ce   :  { %2633 = vmatprep.mubr.msk.bf16.mxu1 %vm2971_vm0, %v2970_v0 }
 0x5a0   :  { %v396_v47 = vpop.f32.mrb[12].mxu1 }
 0x5a1   :  { %v397_v48 = vadd.f32 %v396_v47, %v352_v46  ;;  %v2619_v49 = vpop.f32.mrb[13].mxu1 }
 0x5a2   :  { %v399_v50 = vpop.f32.mrb[14].mxu1 }
 0x5a3   :  { %v400_v51 = vadd.f32 %v399_v50, %v352_v46  ;;  %v2620_v52 = vpop.f32.mrb[15].mxu1  ;;  %v403_v53 = vadd.f32 %v397_v48, %v3019_v3 }
 0x5a5   :  { %v405_v54 = vsel %vm42_vm1, %v403_v53, 0.0  ;;  %v404_v55 = vadd.f32 %v400_v51, %v3025_v4 }
 0x5a6   :  { %406 = vadd.xlane.f32.xlu0 %v405_v54 }
 0x5a7   :  { %v408_v56 = vsel %vm42_vm1, %v404_v55, 0.0 }
 0x5a8   :  { %409 = vadd.xlane.f32.xlu1 %v408_v56 }
 0x5b9   :  { %524 = vrot.lane.b32.xlu1 %v2836_v26, %s2976_s30 }
 0x633   :  { %v407_v57 = vpop.xlane.xlu0 %406 }
 0x634   :  { %v412_v58 = vmul.f32 0.03125, %v407_v57 }
 0x635   :  { %v410_v59 = vpop.xlane.xlu1 %409 }
 0x636   :  { %v414_v60 = vsub.f32 %v403_v53, %v412_v58  ;;  %v413_v61 = vmul.f32 0.03125, %v410_v59 }
 0x638   :  { %v415_v62 = vsub.f32 %v404_v55, %v413_v61  ;;  %v416_v63 = vmul.f32 %v414_v60, %v414_v60 }
 0x639   :  { %v525_v30 = vpop.permute.xlu1 %524 }
 0x63a   :  { %v418_v5 = vsel %vm42_vm1, %v416_v63, 0.0  ;;  %v417_v3 = vmul.f32 %v415_v62, %v415_v62  ;;  %v533_v31 = vsel %vm528_vm3, %v525_v30, 0 }
 0x63b   :  { %419 = vadd.xlane.f32.xlu0 %v418_v5  ;;  %2630 = vmatpush3.bf16.xpose.msra.mxu1 %v533_v31 }
 0x63c   :  { %v421_v6 = vsel %vm42_vm1, %v417_v3, 0.0  ;;  %2631 = vmatprep.subr.bf16.mxu1 %v2970_v0 }
 0x63f   :  { %422 = vadd.xlane.f32.xlu0 %v421_v6 }
 0x655   :  { %526 = vrot.lane.b32.xlu0 %v2839_v28, %s2976_s30 }
 0x6c8   :  { %v420_v4 = vpop.xlane.xlu0 %419 }
 0x6c9   :  { %v424_v8 = vmul.f32 0.03125, %v420_v4 }
 0x6cb   :  { %v426_v11 = vadd.f32 1e-12, %v424_v8 }
 0x6cc   :  { %v423_v12 = vpop.xlane.xlu0 %422 }
 0x6cd   :  { %2874 = vrsqrt.f32 %v426_v11  ;;  %v425_v13 = vmul.f32 0.03125, %v423_v12 }
 0x6cf   :  { %v427_v14 = vadd.f32 1e-12, %v425_v13 }
 0x6d0   :  { %v527_v32 = vpop.permute.xlu0 %526 }
 0x6d1   :  { %2876 = vrsqrt.f32 %v427_v14  ;;  %v536_v33 = vsel %vm528_vm3, %v527_v32, 0 }
 0x6d2   :  { %2632 = vmatpush3.bf16.xpose.msra.mxu1 %v536_v33 }
 0x6d3   :  { %2651 = vmatprep.subr.bf16.mxu1 %v2970_v0 }
 0x6d7   :  { %v2875_v16 = vpop.eup %2874 }
 0x6d8   :  { %v430_v19 = vmul.f32 %v2875_v16, %v414_v60  ;;  %v3158_v60 = vsub.s32 5, %v3034_v7 }
 0x6da   :  { %v436_v18 = vmul.f32 %v435_v17, %v430_v19  ;;  %v523_v61 = vrot.slane %v3039_v9, %v3158_v60 }
 0x6db   :  { %v2877_v21 = vpop.eup %2876 }
 0x6dc   :  { %v431_v22 = vmul.f32 %v2877_v21, %v415_v62  ;;  %v442_v26 = vadd.f32 %v441_v23, %v436_v18 }
 0x6de   :  { %v437_v24 = vmul.f32 %v435_v17, %v431_v22 }
 0x6e0   :  { %v443_v27 = vadd.f32 %v441_v23, %v437_v24 }
 0x6e2   :  { %v444_v28 = vpack.c.bf16 %v443_v27, %v442_v26 }
 0x6e4   :  { %2626 = vmatmul.mubr.msk.bf16.vlgmr.msra.gmra.mrb[8].mxu0 %vm42_vm1, %v444_v28  ;;  %v3175_v28 = vld [vmem:[%s3624_s2 + $0x38] ss:$8 sps:$4 sm:$0xff]  }
 0x6e5   :  { %2641 = vmatprep.mubr.msk.bf16.mxu0 %vm2971_vm0, %v2970_v0 }
 0x7b7   :  { %v494_v36 = vpop.f32.mrb[8].mxu0 }
 0x7b8   :  { %v495_v37 = vadd.f32 %v494_v36, %v448_v35  ;;  %v2627_v38 = vpop.f32.mrb[9].mxu0 }
 0x7b9   :  { %v497_v39 = vpop.f32.mrb[10].mxu0 }
 0x7ba   :  { %v503_v1 = vmul.f32 0.044715, %v495_v37  ;;  %v498_v2 = vadd.f32 %v497_v39, %v448_v35  ;;  %v2628_v40 = vpop.f32.mrb[11].mxu0  ;;  %v501_v54 = vmul.f32 0.5, %v495_v37  ;;  %v3186_v39 = vsub.s32 7, %v3034_v7 }
 0x7bc   :  { %v505_v41 = vmul.f32 %v503_v1, %v495_v37  ;;  %v504_v42 = vmul.f32 0.044715, %v498_v2  ;;  %v502_v55 = vmul.f32 0.5, %v498_v2 }
 0x7be   :  { %v507_v43 = vmul.f32 %v505_v41, %v495_v37  ;;  %v506_v44 = vmul.f32 %v504_v42, %v498_v2 }
 0x7c0   :  { %v509_v46 = vadd.f32 %v507_v43, %v495_v37  ;;  %v508_v47 = vmul.f32 %v506_v44, %v498_v2  ;;  %v3181_v37 = vsub.s32 6, %v3034_v7  ;;  %v616_v43 = vrot.slane %v3039_v9, %v3186_v39  ;;  %v3202_v7 = vld [vmem:[%s3624_s2 + $0x48] ss:$40 sps:$4 sm:$0xff]  }
 0x7c2   :  { %v511_v48 = vmul.f32 0.7978846, %v509_v46  ;;  %v510_v49 = vadd.f32 %v508_v47, %v498_v2  ;;  %v610_v38 = vrot.slane %v3039_v9, %v3181_v37  ;;  %v3205_v9 = vunpack.c.l.bf16 %v3202_v7 }
 0x7c4   :  { %2878 = vtanh.f32 %v511_v48  ;;  %v512_v50 = vmul.f32 0.7978846, %v510_v49  ;;  %v630_v49 = vrot.slane %v3205_v9, %v3042_v10 }
 0x7c6   :  { %2880 = vtanh.f32 %v512_v50 }
 0x7ce   :  { %v2879_v51 = vpop.eup %2878 }
 0x7cf   :  { %v515_v52 = vadd.f32 1.0, %v2879_v51 }
 0x7d0   :  { %v2881_v53 = vpop.eup %2880 }
 0x7d1   :  { %v516_v56 = vadd.f32 1.0, %v2881_v53  ;;  %v517_v57 = vmul.f32 %v515_v52, %v501_v54 }
 0x7d3   :  { %v518_v58 = vmul.f32 %v516_v56, %v502_v55 }
 0x7d5   :  { %v519_v59 = vpack.c.bf16 %v518_v58, %v517_v57 }
 0x7d7   :  { %2634 = vmatmul.mubr.msk.bf16.vlgmr.msra.gmra.mrb[16].mxu1 %vm528_vm3, %v519_v59 }
 0x7d8   :  { %2653 = vmatprep.mubr.msk.bf16.mxu1 %vm2971_vm0, %v2970_v0 }
 0x8aa   :  { %v572_v62 = vpop.f32.mrb[16].mxu1 }
 0x8ab   :  { %v573_v63 = vadd.f32 %v572_v62, %v523_v61  ;;  %v2635_v5 = vpop.f32.mrb[17].mxu1 }
 0x8ac   :  { %v575_v3 = vpop.f32.mrb[18].mxu1 }
 0x8ad   :  { %v576_v6 = vadd.f32 %v575_v3, %v523_v61  ;;  %v2636_v4 = vpop.f32.mrb[19].mxu1  ;;  %v579_v8 = vadd.f32 %v573_v63, %v442_v26 }
 0x8af   :  { %v581_v11 = vsel %vm42_vm1, %v579_v8, 0.0  ;;  %v580_v12 = vadd.f32 %v576_v6, %v443_v27  ;;  %v3169_v27 = vld [vmem:[%s3624_s2 + $0x28] ss:$8 sps:$4 sm:$0xff]  }
 0x8b0   :  { %582 = vadd.xlane.f32.xlu1 %v581_v11  ;;  %2638 = vmatpush3.bf16.msra.mxu0 %v3169_v27 }
 0x8b1   :  { %v584_v13 = vsel %vm42_vm1, %v580_v12, 0.0  ;;  %2639 = vmatprep.subr.bf16.mxu0 %v2970_v0 }
 0x8b2   :  { %585 = vadd.xlane.f32.xlu0 %v584_v13 }
 0x8b4   :  { %2640 = vmatpush3.bf16.msra.mxu0 %v3175_v28 }
 0x8b5   :  { %2645 = vmatprep.subr.bf16.mxu0 %v2970_v0 }
 0x93d   :  { %v583_v14 = vpop.xlane.xlu1 %582 }
 0x93e   :  { %v587_v16 = vmul.f32 0.03125, %v583_v14 }
 0x93f   :  { %v586_v17 = vpop.xlane.xlu0 %585 }
 0x940   :  { %v589_v19 = vsub.f32 %v579_v8, %v587_v16  ;;  %v588_v21 = vmul.f32 0.03125, %v586_v17 }
 0x942   :  { %v590_v18 = vsub.f32 %v580_v12, %v588_v21  ;;  %v591_v22 = vmul.f32 %v589_v19, %v589_v19 }
 0x944   :  { %v593_v23 = vsel %vm42_vm1, %v591_v22, 0.0  ;;  %v592_v24 = vmul.f32 %v590_v18, %v590_v18 }
 0x945   :  { %594 = vadd.xlane.f32.xlu1 %v593_v23 }
 0x946   :  { %v596_v26 = vsel %vm42_vm1, %v592_v24, 0.0 }
 0x947   :  { %597 = vadd.xlane.f32.xlu0 %v596_v26 }
 0x9d2   :  { %v595_v30 = vpop.xlane.xlu1 %594 }
 0x9d3   :  { %v599_v31 = vmul.f32 0.03125, %v595_v30 }
 0x9d4   :  { %v598_v32 = vpop.xlane.xlu0 %597 }
 0x9d5   :  { %v601_v33 = vadd.f32 1e-12, %v599_v31  ;;  %v600_v35 = vmul.f32 0.03125, %v598_v32 }
 0x9d7   :  { %2882 = vrsqrt.f32 %v601_v33  ;;  %v602_v36 = vadd.f32 1e-12, %v600_v35 }
 0x9d9   :  { %2884 = vrsqrt.f32 %v602_v36 }
 0x9e1   :  { %v2883_v1 = vpop.eup %2882 }
 0x9e2   :  { %v605_v2 = vmul.f32 %v2883_v1, %v589_v19 }
 0x9e3   :  { %v2885_v40 = vpop.eup %2884 }
 0x9e4   :  { %v611_v41 = vmul.f32 %v610_v38, %v605_v2  ;;  %v606_v42 = vmul.f32 %v2885_v40, %v590_v18 }
 0x9e6   :  { %v612_v44 = vmul.f32 %v610_v38, %v606_v42  ;;  %v3190_v46 = vadd.f32 %v616_v43, %v611_v41 }
 0x9e8   :  { %v3192_v47 = vadd.f32 %v616_v43, %v612_v44 }
 0x9ea   :  { %v626_v48 = vpack.c.bf16 %v3192_v47, %v3190_v46 }
 0x9ec   :  { %2642 = vmatmul.mubr.msk.bf16.vlgmr.msra.gmra.mrb[12].mxu0 %vm42_vm1, %v626_v48 }
 0x9ed   :  { %2647 = vmatprep.mubr.msk.bf16.mxu0 %vm2971_vm0, %v2970_v0 }
 0xabf   :  { %v680_v50 = vpop.f32.mrb[12].mxu0 }
 0xac0   :  { %v2643_v51 = vpop.f32.mrb[13].mxu0  ;;  %v681_v53 = vadd.f32 %v680_v50, %v630_v49 }
 0xac1   :  { %v683_v52 = vpop.f32.mrb[14].mxu0 }
 0xac2   :  { %v684_v54 = vadd.f32 %v683_v52, %v630_v49  ;;  %v2644_v55 = vpop.f32.mrb[15].mxu0 }
 0xac4   :  { %v3209_v56 = vpack.c.bf16 %v684_v54, %v681_v53 }
 0xac6   :  { %814 = vrot.lane.b32.xlu0 %v3209_v56, %s2974_s24  ;;  %689 = vrot.lane.b32.xlu1 %v3209_v56, %s2973_s23 }
 0xaca   :  { %812 = vrot.lane.b32.xlu1 %v3209_v56, %s2972_s22 }
 0xb38   :  { %v690_v57 = vpop.permute.xlu1 %689  ;;  %v815_v59 = vpop.permute.xlu0 %814 }
 0xb39   :  { %v695_v58 = vsel %vm91_vm2, %v690_v57, 0  ;;  %v820_v61 = vsel %vm91_vm2, %v815_v59, 0 }
 0xb3a   :  { %2646 = vmatpush3.bf16.xpose.msra.mxu0 %v695_v58 }
 0xb3b   :  { %2657 = vmatprep.subr.bf16.mxu0 %v2970_v0 }
 0xb3c   :  { %v813_v62 = vpop.permute.xlu1 %812 }
 0xb41   :  { %2648 = vmatmul.mubr.msk.bf16.vlgmr.msra.gmra.mrb[16].mxu0 %vm91_vm2, %v3209_v56 }
 0xb42   :  { %2658 = vmatpush3.bf16.xpose.msra.mxu0 %v820_v61  ;;  %2659 = vmatprep.mubr.msk.bf16.mxu0 %vm2971_vm0, %v2970_v0 }
 0xb43   :  { %2669 = vmatprep.subr.bf16.mxu0 %v2970_v0 }
 0xb49   :  { %2660 = vmatmul.mubr.msk.bf16.vlgmr.msra.gmra.mrb[20].mxu0 %vm91_vm2, %v813_v62 }
 0xb4a   :  { %2673 = vmatprep.mubr.msk.bf16.mxu0 %vm2971_vm0, %v2970_v0 }
 0xc14   :  { %v731_v63 = vpop.f32.mrb[16].mxu0 }
 0xc15   :  { %v738_v5 = vmul.f32 0.25, %v731_v63  ;;  %v2649_v3 = vpop.f32.mrb[17].mxu0 }
 0xc16   :  { %v734_v6 = vpop.f32.mrb[18].mxu0 }
 0xc17   :  { %v739_v4 = vmul.f32 0.25, %v734_v6  ;;  %v2650_v8 = vpop.f32.mrb[19].mxu0  ;;  %v740_v11 = vadd.f32 %v738_v5, %v3068_v25 }
 0xc19   :  { %v742_v12 = vsel %vm91_vm2, %v740_v11, -inf  ;;  %v741_v13 = vadd.f32 %v739_v4, %v3073_v29 }
 0xc1a   :  { %743 = vmax.xlane.f32.xlu1 %v742_v12 }
 0xc1b   :  { %v745_v14 = vsel %vm91_vm2, %v741_v13, -inf }
 0xc1c   :  { %746 = vmax.xlane.f32.xlu0 %v745_v14  ;;  %v856_v16 = vpop.f32.mrb[20].mxu0 }
 0xc1d   :  { %v863_v17 = vmul.f32 0.25, %v856_v16  ;;  %v2661_v19 = vpop.f32.mrb[21].mxu0 }
 0xc1e   :  { %v859_v21 = vpop.f32.mrb[22].mxu0 }
 0xc1f   :  { %v864_v18 = vmul.f32 0.25, %v859_v21  ;;  %v2662_v22 = vpop.f32.mrb[23].mxu0  ;;  %v865_v23 = vadd.f32 %v863_v17, %v3068_v25 }
 0xc21   :  { %v867_v24 = vsel %vm91_vm2, %v865_v23, -inf  ;;  %v866_v26 = vadd.f32 %v864_v18, %v3073_v29 }
 0xc22   :  { %868 = vmax.xlane.f32.xlu0 %v867_v24 }
 0xc23   :  { %v870_v30 = vsel %vm91_vm2, %v866_v26, -inf }
 0xc24   :  { %871 = vmax.xlane.f32.xlu1 %v870_v30 }
 0xca7   :  { %v744_v31 = vpop.xlane.xlu1 %743 }
 0xca8   :  { %v748_v32 = vsub.f32 %v740_v11, %v744_v31 }
 0xca9   :  { %v747_v33 = vpop.xlane.xlu0 %746 }
 0xcaa   :  { %v750_v35 = vmul.f32 1.442695, %v748_v32  ;;  %v749_v36 = vsub.f32 %v741_v13, %v747_v33  ;;  %v951_v33 = vrot.slane %v3205_v9, %v3120_v45 }
 0xcac   :  { %2886 = vpow2.f32 %v750_v35  ;;  %v752_v38 = vmul.f32 1.442695, %v749_v36 }
 0xcae   :  { %2888 = vpow2.f32 %v752_v38 }
 0xcaf   :  { %v869_v1 = vpop.xlane.xlu0 %868 }
 0xcb0   :  { %v873_v2 = vsub.f32 %v865_v23, %v869_v1 }
 0xcb1   :  { %v872_v40 = vpop.xlane.xlu1 %871 }
 0xcb2   :  { %v875_v25 = vmul.f32 1.442695, %v873_v2  ;;  %v874_v41 = vsub.f32 %v866_v26, %v872_v40 }
 0xcb4   :  { %2890 = vpow2.f32 %v875_v25  ;;  %v877_v42 = vmul.f32 1.442695, %v874_v41 }
 0xcb6   :  { %v2887_v29 = vpop.eup %2886  ;;  %2892 = vpow2.f32 %v877_v42 }
 0xcb7   :  { %v754_v43 = vsel %vm91_vm2, %v2887_v29, 0.0 }
 0xcb8   :  { %v2889_v44 = vpop.eup %2888  ;;  %755 = vadd.xlane.f32.xlu0 %v754_v43 }
 0xcb9   :  { %v757_v48 = vsel %vm91_vm2, %v2889_v44, 0.0 }
 0xcba   :  { %758 = vadd.xlane.f32.xlu1 %v757_v48 }
 0xcbe   :  { %v2891_v49 = vpop.eup %2890 }
 0xcbf   :  { %v879_v50 = vsel %vm91_vm2, %v2891_v49, 0.0 }
 0xcc0   :  { %v2893_v51 = vpop.eup %2892  ;;  %880 = vadd.xlane.f32.xlu0 %v879_v50 }
 0xcc1   :  { %v882_v52 = vsel %vm91_vm2, %v2893_v51, 0.0 }
 0xcc2   :  { %883 = vadd.xlane.f32.xlu1 %v882_v52 }
 0xcd3   :  { %890 = vrot.lane.b32.xlu1 %v3209_v56, %s2975_s29 }
 0xcd6   :  { %765 = vrot.lane.b32.xlu0 %v3209_v56, %s2976_s30 }
 0xcd7   :  { %952 = vrot.lane.b32.xlu1 %v3169_v27, %s2977_s8 }
 0xcdb   :  { %954 = vrot.lane.b32.xlu1 %v3175_v28, %s2977_s8 }
 0xd45   :  { %v756_v53 = vpop.xlane.xlu0 %755 }
 0xd46   :  { %2894 = vrcp.f32 %v756_v53 }
 0xd47   :  { %v759_v54 = vpop.xlane.xlu1 %758 }
 0xd48   :  { %2896 = vrcp.f32 %v759_v54 }
 0xd4d   :  { %v881_v55 = vpop.xlane.xlu0 %880 }
 0xd4e   :  { %2898 = vrcp.f32 %v881_v55  ;;  %v3281_v55 = vld [vmem:[%s3624_s2 + $0x3c] ss:$8 sps:$4 sm:$0xff]  }
 0xd4f   :  { %v884_v57 = vpop.xlane.xlu1 %883 }
 0xd50   :  { %v2895_v58 = vpop.eup %2894  ;;  %2900 = vrcp.f32 %v884_v57 }
 0xd51   :  { %v766_v59 = vpop.permute.xlu0 %765  ;;  %v762_v62 = vmul.f32 %v2895_v58, %v2887_v29 }
 0xd52   :  { %v2897_v61 = vpop.eup %2896  ;;  %2652 = vmatpush3.bf16.msra.mxu1 %v766_v59 }
 0xd53   :  { %v763_v56 = vmul.f32 %v2897_v61, %v2889_v44  ;;  %2663 = vmatprep.subr.bf16.mxu1 %v2970_v0  ;;  %v891_v63 = vpop.permute.xlu1 %890 }
 0xd55   :  { %v764_v27 = vpack.c.bf16 %v763_v56, %v762_v62 }
 0xd57   :  { %2654 = vmatmul.mubr.msk.bf16.vlgmr.msra.gmra.mrb[20].mxu1 %vm91_vm2, %v764_v27  ;;  %v953_v8 = vpop.permute.xlu1 %952 }
 0xd58   :  { %v2899_v28 = vpop.eup %2898  ;;  %2664 = vmatpush3.bf16.msra.mxu1 %v891_v63  ;;  %2665 = vmatprep.mubr.msk.bf16.mxu1 %vm2971_vm0, %v2970_v0  ;;  %v1033_v63 = vrot.slane %v3205_v9, %v3133_v15 }
 0xd59   :  { %2677 = vmatprep.subr.bf16.mxu1 %v2970_v0  ;;  %v887_v3 = vmul.f32 %v2899_v28, %v2891_v49  ;;  %2670 = vmatpush3.bf16.msra.mxu0 %v953_v8 }
 0xd5a   :  { %v2901_v5 = vpop.eup %2900  ;;  %2671 = vmatprep.subr.bf16.mxu0 %v2970_v0 }
 0xd5b   :  { %v888_v6 = vmul.f32 %v2901_v5, %v2893_v51  ;;  %v955_v14 = vpop.permute.xlu1 %954 }
 0xd5d   :  { %v889_v4 = vpack.c.bf16 %v888_v6, %v887_v3  ;;  %2672 = vmatpush3.bf16.msra.mxu0 %v955_v14 }
 0xd5e   :  { %2685 = vmatprep.subr.bf16.mxu0 %v2970_v0 }
 0xd5f   :  { %2666 = vmatmul.mubr.msk.bf16.vlgmr.msra.gmra.mrb[24].mxu1 %vm91_vm2, %v889_v4  ;;  %v1039_v4 = vrot.slane %v3205_v9, %v3138_v20 }
 0xd60   :  { %2681 = vmatprep.mubr.msk.bf16.mxu1 %vm2971_vm0, %v2970_v0 }
 0xe2a   :  { %v805_v11 = vpop.f32.mrb[20].mxu1 }
 0xe2b   :  { %v2655_v12 = vpop.f32.mrb[21].mxu1 }
 0xe2c   :  { %v808_v13 = vpop.f32.mrb[22].mxu1 }
 0xe2d   :  { %v2656_v16 = vpop.f32.mrb[23].mxu1 }
 0xe2e   :  { %v3306_v16 = vld [vmem:[%s3624_s2 + $0x60] ss:$8 sps:$4 sm:$0xff]  }
 0xe32   :  { %v930_v17 = vpop.f32.mrb[24].mxu1 }
 0xe33   :  { %v2667_v19 = vpop.f32.mrb[25].mxu1 }
 0xe34   :  { %v933_v21 = vpop.f32.mrb[26].mxu1  ;;  %v3318_v19 = vld [vmem:[%s3625_s0 + $0x18] sm:$0xff] }
 0xe35   :  { %v2819_v18 = vpack.i.bf16 %v933_v21, %v930_v17  ;;  %v2668_v22 = vpop.f32.mrb[27].mxu1  ;;  %v3313_v17 = vld [vmem:[%s3625_s0 + $0x10] sm:$0xff] }
 0xe36   :  { %v1236_v21 = vpack.c.bf16 %v3318_v19, %v3313_v17 }
 0xe37   :  { %2820 = vrot.lane.b32.xlu0 %v2819_v18, %s2978_s9  ;;  %v1046_v18 = vrot.slane %v3205_v9, %v3150_v34 }
 0xea9   :  { %v2821_v23 = vpop.permute.xlu0 %2820 }
 0xeaa   :  { %v2823_v24 = vunpack.i.h.bf16 %v2821_v23  ;;  %v2822_v26 = vunpack.i.l.bf16 %v2821_v23 }
 0xeac   :  { %v946_v30 = vsel %vm91_vm2, %v808_v13, %v2823_v24  ;;  %v945_v31 = vsel %vm91_vm2, %v805_v11, %v2822_v26  ;;  %v3297_v13 = vld [vmem:[%s3624_s2 + $0x50] ss:$8 sps:$4 sm:$0xff]  }
 0xead   :  { %v947_v32 = vpack.c.bf16 %v946_v30, %v945_v31 }
 0xeaf   :  { %2674 = vmatmul.mubr.msk.bf16.vlgmr.msra.gmra.mrb[24].mxu0 %vm42_vm1, %v947_v32 }
 0xeb0   :  { %2689 = vmatprep.mubr.msk.bf16.mxu0 %vm2971_vm0, %v2970_v0 }
 0xf82   :  { %v995_v35 = vpop.f32.mrb[24].mxu0 }
 0xf83   :  { %v996_v36 = vadd.f32 %v995_v35, %v951_v33  ;;  %v2675_v38 = vpop.f32.mrb[25].mxu0 }
 0xf84   :  { %v998_v1 = vpop.f32.mrb[26].mxu0 }
 0xf85   :  { %v999_v2 = vadd.f32 %v998_v1, %v951_v33  ;;  %v2676_v40 = vpop.f32.mrb[27].mxu0  ;;  %v1002_v25 = vadd.f32 %v996_v36, %v3190_v46  ;;  %v3331_v33 = vunpack.c.h.bf16 %v3202_v7 }
 0xf87   :  { %v1004_v41 = vsel %vm42_vm1, %v1002_v25, 0.0  ;;  %v1003_v42 = vadd.f32 %v999_v2, %v3192_v47  ;;  %v3275_v47 = vld [vmem:[%s3624_s2 + $0x2c] ss:$8 sps:$4 sm:$0xff]   ;;  %v1240_v2 = vrot.slane %v3331_v33, %v3042_v10 }
 0xf88   :  { %1005 = vadd.xlane.f32.xlu0 %v1004_v41  ;;  %2678 = vmatpush3.bf16.msra.mxu1 %v3275_v47 }
 0xf89   :  { %v1007_v29 = vsel %vm42_vm1, %v1003_v42, 0.0  ;;  %2679 = vmatprep.subr.bf16.mxu1 %v2970_v0 }
 0xf8a   :  { %1008 = vadd.xlane.f32.xlu1 %v1007_v29 }
 0xf8c   :  { %2680 = vmatpush3.bf16.msra.mxu1 %v3281_v55 }
 0xf8d   :  { %2693 = vmatprep.subr.bf16.mxu1 %v2970_v0 }
0x1015   :  { %v1006_v43 = vpop.xlane.xlu0 %1005 }
0x1016   :  { %v1010_v44 = vmul.f32 0.03125, %v1006_v43 }
0x1017   :  { %v1009_v48 = vpop.xlane.xlu1 %1008 }
0x1018   :  { %v1012_v49 = vsub.f32 %v1002_v25, %v1010_v44  ;;  %v1011_v50 = vmul.f32 0.03125, %v1009_v48 }
0x101a   :  { %v1013_v51 = vsub.f32 %v1003_v42, %v1011_v50  ;;  %v1014_v52 = vmul.f32 %v1012_v49, %v1012_v49 }
0x101c   :  { %v1016_v53 = vsel %vm42_vm1, %v1014_v52, 0.0  ;;  %v1015_v54 = vmul.f32 %v1013_v51, %v1013_v51 }
0x101d   :  { %1017 = vadd.xlane.f32.xlu0 %v1016_v53 }
0x101e   :  { %v1019_v46 = vsel %vm42_vm1, %v1015_v54, 0.0 }
0x1021   :  { %1020 = vadd.xlane.f32.xlu0 %v1019_v46 }
0x10aa   :  { %v1018_v57 = vpop.xlane.xlu0 %1017 }
0x10ab   :  { %v1022_v58 = vmul.f32 0.03125, %v1018_v57 }
0x10ad   :  { %v1024_v59 = vadd.f32 1e-12, %v1022_v58 }
0x10ae   :  { %v1021_v61 = vpop.xlane.xlu0 %1020 }
0x10af   :  { %2902 = vrsqrt.f32 %v1024_v59  ;;  %v1023_v62 = vmul.f32 0.03125, %v1021_v61 }
0x10b1   :  { %v1025_v56 = vadd.f32 1e-12, %v1023_v62 }
0x10b3   :  { %2904 = vrsqrt.f32 %v1025_v56 }
0x10b9   :  { %v2903_v27 = vpop.eup %2902 }
0x10ba   :  { %v1028_v28 = vmul.f32 %v2903_v27, %v1012_v49 }
0x10bc   :  { %v1034_v3 = vmul.f32 %v1033_v63, %v1028_v28 }
0x10bd   :  { %v2905_v5 = vpop.eup %2904 }
0x10be   :  { %v1029_v6 = vmul.f32 %v2905_v5, %v1013_v51  ;;  %v3290_v11 = vadd.f32 %v1039_v4, %v1034_v3 }
0x10c0   :  { %v1035_v8 = vmul.f32 %v1033_v63, %v1029_v6  ;;  %v3363_v6 = vld [vmem:[%s3626_s1 + $0x10] sm:$0xff] }
0x10c2   :  { %v3292_v12 = vadd.f32 %v1039_v4, %v1035_v8 }
0x10c4   :  { %v1042_v14 = vpack.c.bf16 %v3292_v12, %v3290_v11 }
0x10c6   :  { %2682 = vmatmul.mubr.msk.bf16.vlgmr.msra.gmra.mrb[28].mxu1 %vm42_vm1, %v1042_v14 }
0x10c7   :  { %2694 = vmatpush3.bf16.msra.mxu1 %v3297_v13  ;;  %2697 = vmatprep.mubr.msk.bf16.mxu1 %vm2971_vm0, %v2970_v0 }
0x10c8   :  { %2695 = vmatprep.subr.bf16.mxu1 %v2970_v0 }
0x10cb   :  { %2696 = vmatpush3.bf16.msra.mxu1 %v3306_v16 }
0x10cc   :  { %2701 = vmatprep.subr.bf16.mxu1 %v2970_v0 }
0x10ce   :  { %2698 = vmatmul.mubr.msk.bf16.vlgmr.msra.gmra.mrb[32].mxu1 %vm42_vm1, %v1236_v21  ;;  %v3368_v21 = vld [vmem:[%s3626_s1 + $0x18] sm:$0xff] }
0x10cf   :  { %2703 = vmatprep.mubr.msk.bf16.mxu1 %vm2971_vm0, %v2970_v0 }
0x1199   :  { %v1092_v22 = vpop.f32.mrb[28].mxu1 }
0x119a   :  { %v1093_v23 = vadd.f32 %v1092_v22, %v1046_v18  ;;  %v2683_v24 = vpop.f32.mrb[29].mxu1 }
0x119b   :  { %v1095_v26 = vpop.f32.mrb[30].mxu1 }
0x119c   :  { %v1101_v30 = vmul.f32 0.044715, %v1093_v23  ;;  %v1096_v31 = vadd.f32 %v1095_v26, %v1046_v18  ;;  %v2684_v32 = vpop.f32.mrb[31].mxu1  ;;  %v1099_v46 = vmul.f32 0.5, %v1093_v23 }
0x119e   :  { %v1103_v35 = vmul.f32 %v1101_v30, %v1093_v23  ;;  %v1102_v36 = vmul.f32 0.044715, %v1096_v31  ;;  %v1100_v57 = vmul.f32 0.5, %v1096_v31 }
0x11a0   :  { %v1105_v38 = vmul.f32 %v1103_v35, %v1093_v23  ;;  %v1104_v1 = vmul.f32 %v1102_v36, %v1096_v31 }
0x11a1   :  { %v1290_v40 = vpop.f32.mrb[32].mxu1 }
0x11a2   :  { %v1107_v25 = vadd.f32 %v1105_v38, %v1093_v23  ;;  %v1106_v41 = vmul.f32 %v1104_v1, %v1096_v31  ;;  %v2699_v42 = vpop.f32.mrb[33].mxu1  ;;  %v1291_v48 = vadd.f32 %v1290_v40, %v1240_v2 }
0x11a3   :  { %v1293_v29 = vpop.f32.mrb[34].mxu1 }
0x11a4   :  { %v1109_v43 = vmul.f32 0.7978846, %v1107_v25  ;;  %v1108_v44 = vadd.f32 %v1106_v41, %v1096_v31  ;;  %v1294_v49 = vadd.f32 %v1293_v29, %v1240_v2  ;;  %v2700_v50 = vpop.f32.mrb[35].mxu1 }
0x11a6   :  { %2906 = vtanh.f32 %v1109_v43  ;;  %v1110_v7 = vmul.f32 0.7978846, %v1108_v44  ;;  %v3335_v51 = vpack.c.bf16 %v1294_v49, %v1291_v48 }
0x11a8   :  { %2908 = vtanh.f32 %v1110_v7  ;;  %1424 = vrot.lane.b32.xlu0 %v3335_v51, %s2974_s24  ;;  %1299 = vrot.lane.b32.xlu1 %v3335_v51, %s2973_s23 }
0x11ac   :  { %1422 = vrot.lane.b32.xlu1 %v3335_v51, %s2972_s22 }
0x11b0   :  { %v2907_v52 = vpop.eup %2906 }
0x11b1   :  { %v1113_v53 = vadd.f32 1.0, %v2907_v52 }
0x11b2   :  { %v2909_v54 = vpop.eup %2908 }
0x11b3   :  { %v1114_v58 = vadd.f32 1.0, %v2909_v54  ;;  %v3343_v59 = vmul.f32 %v1113_v53, %v1099_v46 }
0x11b5   :  { %v3345_v61 = vmul.f32 %v1114_v58, %v1100_v57 }
0x11b7   :  { %v1117_v62 = vpack.c.bf16 %v3345_v61, %v3343_v59 }
0x121a   :  { %v1300_v56 = vpop.permute.xlu1 %1299  ;;  %v1425_v63 = vpop.permute.xlu0 %1424 }
0x121b   :  { %v1305_v27 = vsel %vm91_vm2, %v1300_v56, 0  ;;  %v1430_v28 = vsel %vm91_vm2, %v1425_v63, 0 }
0x121c   :  { %2702 = vmatpush3.bf16.xpose.msra.mxu1 %v1305_v27 }
0x121d   :  { %2713 = vmatprep.subr.bf16.mxu1 %v2970_v0 }
0x121e   :  { %v1423_v5 = vpop.permute.xlu1 %1422 }
0x1223   :  { %2704 = vmatmul.mubr.msk.bf16.vlgmr.msra.gmra.mrb[36].mxu1 %vm91_vm2, %v3335_v51 }
0x1224   :  { %2714 = vmatpush3.bf16.xpose.msra.mxu1 %v1430_v28  ;;  %2715 = vmatprep.mubr.msk.bf16.mxu1 %vm2971_vm0, %v2970_v0 }
0x1225   :  { %2725 = vmatprep.subr.bf16.mxu1 %v2970_v0 }
0x122b   :  { %2716 = vmatmul.mubr.msk.bf16.vlgmr.msra.gmra.mrb[40].mxu1 %vm91_vm2, %v1423_v5 }
0x122c   :  { %2729 = vmatprep.mubr.msk.bf16.mxu1 %vm2971_vm0, %v2970_v0 }
0x12f6   :  { %v1341_v3 = vpop.f32.mrb[36].mxu1 }
0x12f7   :  { %v1348_v4 = vmul.f32 0.25, %v1341_v3  ;;  %v2705_v8 = vpop.f32.mrb[37].mxu1 }
0x12f8   :  { %v1344_v14 = vpop.f32.mrb[38].mxu1 }
0x12f9   :  { %v1349_v18 = vmul.f32 0.25, %v1344_v14  ;;  %v2706_v22 = vpop.f32.mrb[39].mxu1  ;;  %v1350_v23 = vadd.f32 %v3363_v6, %v1348_v4 }
0x12fb   :  { %v1352_v24 = vsel %vm91_vm2, %v1350_v23, -inf  ;;  %v1351_v26 = vadd.f32 %v3368_v21, %v1349_v18 }
0x12fc   :  { %1353 = vmax.xlane.f32.xlu1 %v1352_v24 }
0x12fd   :  { %v1355_v30 = vsel %vm91_vm2, %v1351_v26, -inf }
0x12fe   :  { %1356 = vmax.xlane.f32.xlu0 %v1355_v30  ;;  %v1466_v31 = vpop.f32.mrb[40].mxu1 }
0x12ff   :  { %v1473_v32 = vmul.f32 0.25, %v1466_v31  ;;  %v2717_v35 = vpop.f32.mrb[41].mxu1 }
0x1300   :  { %v1469_v36 = vpop.f32.mrb[42].mxu1 }
0x1301   :  { %v1474_v38 = vmul.f32 0.25, %v1469_v36  ;;  %v2718_v1 = vpop.f32.mrb[43].mxu1  ;;  %v1475_v2 = vadd.f32 %v3363_v6, %v1473_v32 }
0x1303   :  { %v1477_v40 = vsel %vm91_vm2, %v1475_v2, -inf  ;;  %v1476_v25 = vadd.f32 %v3368_v21, %v1474_v38 }
0x1304   :  { %1478 = vmax.xlane.f32.xlu0 %v1477_v40 }
0x1305   :  { %v1480_v41 = vsel %vm91_vm2, %v1476_v25, -inf }
0x1306   :  { %1481 = vmax.xlane.f32.xlu1 %v1480_v41 }
0x131a   :  { %1122 = vrot.lane.b32.xlu0 %v3275_v47, %s2976_s30 }
0x1389   :  { %v1354_v42 = vpop.xlane.xlu1 %1353 }
0x138a   :  { %v1358_v29 = vsub.f32 %v1350_v23, %v1354_v42 }
0x138b   :  { %v1357_v43 = vpop.xlane.xlu0 %1356 }
0x138c   :  { %v1360_v44 = vmul.f32 1.442695, %v1358_v29  ;;  %v1359_v48 = vsub.f32 %v1351_v26, %v1357_v43 }
0x138e   :  { %2910 = vpow2.f32 %v1360_v44  ;;  %v1362_v49 = vmul.f32 1.442695, %v1359_v48 }
0x1390   :  { %2912 = vpow2.f32 %v1362_v49 }
0x1391   :  { %v1479_v50 = vpop.xlane.xlu0 %1478 }
0x1392   :  { %v1483_v7 = vsub.f32 %v1475_v2, %v1479_v50 }
0x1393   :  { %v1482_v52 = vpop.xlane.xlu1 %1481 }
0x1394   :  { %v1485_v53 = vmul.f32 1.442695, %v1483_v7  ;;  %v1484_v54 = vsub.f32 %v1476_v25, %v1482_v52 }
0x1395   :  { %v1123_v46 = vpop.permute.xlu0 %1122 }
0x1396   :  { %2914 = vpow2.f32 %v1485_v53  ;;  %v1487_v57 = vmul.f32 1.442695, %v1484_v54  ;;  %v1130_v58 = vsel %vm528_vm3, %v1123_v46, 0 }
0x1397   :  { %2686 = vmatpush3.bf16.xpose.msra.mxu0 %v1130_v58 }
0x1398   :  { %v2911_v47 = vpop.eup %2910  ;;  %2916 = vpow2.f32 %v1487_v57  ;;  %2687 = vmatprep.subr.bf16.mxu0 %v2970_v0 }
0x1399   :  { %v1364_v56 = vsel %vm91_vm2, %v2911_v47, 0.0 }
0x139a   :  { %v2913_v27 = vpop.eup %2912  ;;  %1365 = vadd.xlane.f32.xlu0 %v1364_v56 }
0x139b   :  { %v1367_v63 = vsel %vm91_vm2, %v2913_v27, 0.0 }
0x139c   :  { %1368 = vadd.xlane.f32.xlu1 %v1367_v63 }
0x13a0   :  { %v2915_v28 = vpop.eup %2914 }
0x13a1   :  { %v1489_v5 = vsel %vm91_vm2, %v2915_v28, 0.0 }
0x13a2   :  { %v2917_v3 = vpop.eup %2916  ;;  %1490 = vadd.xlane.f32.xlu1 %v1489_v5 }
0x13a3   :  { %v1492_v4 = vsel %vm91_vm2, %v2917_v3, 0.0 }
0x13a6   :  { %1493 = vadd.xlane.f32.xlu1 %v1492_v4 }
0x13b0   :  { %1375 = vrot.lane.b32.xlu0 %v3335_v51, %s2976_s30 }
0x13b4   :  { %1500 = vrot.lane.b32.xlu0 %v3335_v51, %s2975_s29 }
0x13b7   :  { %1124 = vrot.lane.b32.xlu1 %v3281_v55, %s2976_s30 }
0x13bb   :  { %1562 = vrot.lane.b32.xlu1 %v3297_v13, %s2977_s8 }
0x13bf   :  { %1564 = vrot.lane.b32.xlu1 %v3306_v16, %s2977_s8 }
0x1427   :  { %v1366_v22 = vpop.xlane.xlu0 %1365 }
0x1429   :  { %v1369_v8 = vpop.xlane.xlu1 %1368 }
0x142a   :  { %2918 = vrcp.f32 %v1369_v8 }
0x142b   :  { %2920 = vrcp.f32 %v1366_v22  ;;  %v1376_v51 = vpop.permute.xlu0 %1375 }
0x142f   :  { %v1491_v14 = vpop.xlane.xlu1 %1490  ;;  %v1501_v32 = vpop.permute.xlu0 %1500 }
0x1433   :  { %v1494_v18 = vpop.xlane.xlu1 %1493 }
0x1434   :  { %2922 = vrcp.f32 %v1494_v18  ;;  %v2919_v55 = vpop.eup %2918 }
0x1435   :  { %2924 = vrcp.f32 %v1491_v14  ;;  %v2921_v13 = vpop.eup %2920  ;;  %v1373_v16 = vmul.f32 %v2919_v55, %v2913_v27 }
0x1436   :  { %v1372_v26 = vmul.f32 %v2921_v13, %v2911_v47  ;;  %v1561_v47 = vrot.slane %v3331_v33, %v3120_v45 }
0x1437   :  { %v1125_v23 = vpop.permute.xlu1 %1124 }
0x1438   :  { %v1133_v24 = vsel %vm528_vm3, %v1125_v23, 0  ;;  %v1374_v30 = vpack.c.bf16 %v1373_v16, %v1372_v26 }
0x1439   :  { %2688 = vmatpush3.bf16.xpose.msra.mxu0 %v1133_v24 }
0x143a   :  { %2707 = vmatprep.subr.bf16.mxu0 %v2970_v0 }
0x143b   :  { %v1563_v36 = vpop.permute.xlu1 %1562 }
0x143c   :  { %2726 = vmatpush3.bf16.msra.mxu1 %v1563_v36 }
0x143d   :  { %2727 = vmatprep.subr.bf16.mxu1 %v2970_v0 }
0x143e   :  { %v2923_v31 = vpop.eup %2922 }
0x143f   :  { %v2925_v35 = vpop.eup %2924  ;;  %v1498_v59 = vmul.f32 %v2923_v31, %v2917_v3  ;;  %v1565_v29 = vpop.permute.xlu1 %1564  ;;  %v2851_v31 = vld [vmem:[%s3624_s2 + $0x64] ss:$8 sps:$4 sm:$0xff]  }
0x1440   :  { %2690 = vmatmul.mubr.msk.bf16.vlgmr.msra.gmra.mrb[28].mxu0 %vm528_vm3, %v1117_v62  ;;  %v1497_v61 = vmul.f32 %v2925_v35, %v2915_v28  ;;  %2728 = vmatpush3.bf16.msra.mxu1 %v1565_v29 }
0x1441   :  { %2708 = vmatpush3.bf16.msra.mxu0 %v1376_v51  ;;  %2709 = vmatprep.mubr.msk.bf16.mxu0 %vm2971_vm0, %v2970_v0 }
0x1442   :  { %2719 = vmatprep.subr.bf16.mxu0 %v2970_v0  ;;  %v1499_v62 = vpack.c.bf16 %v1498_v59, %v1497_v61  ;;  %2741 = vmatprep.subr.bf16.mxu1 %v2970_v0 }
0x1448   :  { %2710 = vmatmul.mubr.msk.bf16.vlgmr.msra.gmra.mrb[32].mxu0 %vm91_vm2, %v1374_v30 }
0x1449   :  { %2720 = vmatpush3.bf16.msra.mxu0 %v1501_v32  ;;  %2721 = vmatprep.mubr.msk.bf16.mxu0 %vm2971_vm0, %v2970_v0 }
0x144a   :  { %2733 = vmatprep.subr.bf16.mxu0 %v2970_v0 }
0x1450   :  { %2722 = vmatmul.mubr.msk.bf16.vlgmr.msra.gmra.mrb[36].mxu0 %vm91_vm2, %v1499_v62 }
0x1451   :  { %2737 = vmatprep.mubr.msk.bf16.mxu0 %vm2971_vm0, %v2970_v0 }
0x1513   :  { %v3413_v38 = vpop.f32.mrb[28].mxu0 }
0x1514   :  { %v2691_v1 = vpop.f32.mrb[29].mxu0 }
0x1515   :  { %v3415_v2 = vpop.f32.mrb[30].mxu0 }
0x1516   :  { %v2692_v40 = vpop.f32.mrb[31].mxu0 }
0x1517   :  { %v1643_v40 = vrot.slane %v3331_v33, %v3133_v15 }
0x151b   :  { %v1415_v25 = vpop.f32.mrb[32].mxu0 }
0x151c   :  { %v2711_v41 = vpop.f32.mrb[33].mxu0 }
0x151d   :  { %v1418_v42 = vpop.f32.mrb[34].mxu0 }
0x151e   :  { %v2712_v43 = vpop.f32.mrb[35].mxu0 }
0x151f   :  { %v1649_v43 = vrot.slane %v3331_v33, %v3138_v20 }
0x1523   :  { %v1540_v44 = vpop.f32.mrb[36].mxu0 }
0x1524   :  { %v2723_v48 = vpop.f32.mrb[37].mxu0 }
0x1525   :  { %v1543_v49 = vpop.f32.mrb[38].mxu0 }
0x1526   :  { %v2824_v50 = vpack.i.bf16 %v1543_v49, %v1540_v44  ;;  %v2724_v7 = vpop.f32.mrb[39].mxu0 }
0x1528   :  { %2825 = vrot.lane.b32.xlu0 %v2824_v50, %s2978_s9 }
0x159a   :  { %v2826_v52 = vpop.permute.xlu0 %2825 }
0x159b   :  { %v2828_v53 = vunpack.i.h.bf16 %v2826_v52  ;;  %v2827_v54 = vunpack.i.l.bf16 %v2826_v52 }
0x159d   :  { %v1556_v46 = vsel %vm91_vm2, %v1418_v42, %v2828_v53  ;;  %v1555_v57 = vsel %vm91_vm2, %v1415_v25, %v2827_v54 }
0x159e   :  { %v1557_v58 = vpack.c.bf16 %v1556_v46, %v1555_v57  ;;  %v1656_v46 = vrot.slane %v3331_v33, %v3150_v34 }
0x15a0   :  { %2730 = vmatmul.mubr.msk.bf16.vlgmr.msra.gmra.mrb[44].mxu1 %vm42_vm1, %v1557_v58 }
0x15a1   :  { %2745 = vmatprep.mubr.msk.bf16.mxu1 %vm2971_vm0, %v2970_v0 }
0x1673   :  { %v1605_v56 = vpop.f32.mrb[44].mxu1 }
0x1674   :  { %v1606_v27 = vadd.f32 %v1605_v56, %v1561_v47  ;;  %v2731_v63 = vpop.f32.mrb[45].mxu1 }
0x1675   :  { %v1608_v28 = vpop.f32.mrb[46].mxu1 }
0x1676   :  { %v1609_v5 = vadd.f32 %v1608_v28, %v1561_v47  ;;  %v2732_v3 = vpop.f32.mrb[47].mxu1  ;;  %v1612_v4 = vadd.f32 %v3313_v17, %v1606_v27 }
0x1678   :  { %v1614_v8 = vsel %vm42_vm1, %v1612_v4, 0.0  ;;  %v1613_v14 = vadd.f32 %v3318_v19, %v1609_v5  ;;  %v2850_v19 = vld [vmem:[%s3624_s2 + $0x54] ss:$8 sps:$4 sm:$0xff]  }
0x1679   :  { %1615 = vadd.xlane.f32.xlu0 %v1614_v8  ;;  %2734 = vmatpush3.bf16.msra.mxu0 %v2850_v19 }
0x167a   :  { %v1617_v18 = vsel %vm42_vm1, %v1613_v14, 0.0  ;;  %2735 = vmatprep.subr.bf16.mxu0 %v2970_v0 }
0x167b   :  { %1618 = vadd.xlane.f32.xlu1 %v1617_v18 }
0x167d   :  { %2736 = vmatpush3.bf16.msra.mxu0 %v2851_v31 }
0x167e   :  { %2749 = vmatprep.subr.bf16.mxu0 %v2970_v0 }
0x168c   :  { %1732 = vrot.lane.b32.xlu1 %v2850_v19, %s2976_s30 }
0x1706   :  { %v1616_v22 = vpop.xlane.xlu0 %1615 }
0x1707   :  { %v1620_v23 = vmul.f32 0.03125, %v1616_v22 }
0x1708   :  { %v1619_v24 = vpop.xlane.xlu1 %1618 }
0x1709   :  { %v1622_v55 = vsub.f32 %v1612_v4, %v1620_v23  ;;  %v1621_v51 = vmul.f32 0.03125, %v1619_v24 }
0x170b   :  { %v1623_v13 = vsub.f32 %v1613_v14, %v1621_v51  ;;  %v1624_v16 = vmul.f32 %v1622_v55, %v1622_v55 }
0x170c   :  { %v1733_v7 = vpop.permute.xlu1 %1732 }
0x170d   :  { %v1626_v26 = vsel %vm42_vm1, %v1624_v16, 0.0  ;;  %v1625_v30 = vmul.f32 %v1623_v13, %v1623_v13  ;;  %v1740_v52 = vsel %vm528_vm3, %v1733_v7, 0 }
0x170e   :  { %1627 = vadd.xlane.f32.xlu0 %v1626_v26  ;;  %2742 = vmatpush3.bf16.xpose.msra.mxu1 %v1740_v52 }
0x170f   :  { %v1629_v17 = vsel %vm42_vm1, %v1625_v30, 0.0  ;;  %2743 = vmatprep.subr.bf16.mxu1 %v2970_v0 }
0x1712   :  { %1630 = vadd.xlane.f32.xlu0 %v1629_v17 }
0x1728   :  { %1734 = vrot.lane.b32.xlu0 %v2851_v31, %s2976_s30 }
0x179b   :  { %v1628_v32 = vpop.xlane.xlu0 %1627 }
0x179c   :  { %v1632_v35 = vmul.f32 0.03125, %v1628_v32  ;;  %v1731_v32 = vrot.slane %v3331_v33, %v3158_v60 }
0x179e   :  { %v1634_v59 = vadd.f32 1e-12, %v1632_v35 }
0x179f   :  { %v1631_v61 = vpop.xlane.xlu0 %1630 }
0x17a0   :  { %2926 = vrsqrt.f32 %v1634_v59  ;;  %v1633_v62 = vmul.f32 0.03125, %v1631_v61 }
0x17a2   :  { %v1635_v36 = vadd.f32 1e-12, %v1633_v62 }
0x17a3   :  { %v1735_v53 = vpop.permute.xlu0 %1734 }
0x17a4   :  { %2928 = vrsqrt.f32 %v1635_v36  ;;  %v1743_v54 = vsel %vm528_vm3, %v1735_v53, 0 }
0x17a5   :  { %2744 = vmatpush3.bf16.xpose.msra.mxu1 %v1743_v54 }
0x17a6   :  { %2763 = vmatprep.subr.bf16.mxu1 %v2970_v0 }
0x17aa   :  { %v2927_v1 = vpop.eup %2926 }
0x17ab   :  { %v1638_v25 = vmul.f32 %v2927_v1, %v1622_v55 }
0x17ad   :  { %v1644_v42 = vmul.f32 %v1643_v40, %v1638_v25 }
0x17ae   :  { %v2929_v41 = vpop.eup %2928 }
0x17af   :  { %v1639_v29 = vmul.f32 %v2929_v41, %v1623_v13  ;;  %v1650_v48 = vadd.f32 %v1649_v43, %v1644_v42 }
0x17b1   :  { %v1645_v44 = vmul.f32 %v1643_v40, %v1639_v29 }
0x17b3   :  { %v1651_v49 = vadd.f32 %v1649_v43, %v1645_v44 }
0x17b5   :  { %v1652_v50 = vpack.c.bf16 %v1651_v49, %v1650_v48 }
0x17b7   :  { %2738 = vmatmul.mubr.msk.bf16.vlgmr.msra.gmra.mrb[40].mxu0 %vm42_vm1, %v1652_v50 }
0x17b8   :  { %2753 = vmatprep.mubr.msk.bf16.mxu0 %vm2971_vm0, %v2970_v0 }
0x188a   :  { %v1702_v57 = vpop.f32.mrb[40].mxu0 }
0x188b   :  { %v1703_v58 = vadd.f32 %v1702_v57, %v1656_v46  ;;  %v2739_v47 = vpop.f32.mrb[41].mxu0  ;;  %v3473_v57 = vld [vmem:[%s3624_s2 + $0x88] ss:$8 sps:$4 sm:$0xff]  }
0x188c   :  { %v1705_v56 = vpop.f32.mrb[42].mxu0 }
0x188d   :  { %v1711_v27 = vmul.f32 0.044715, %v1703_v58  ;;  %v1706_v63 = vadd.f32 %v1705_v56, %v1656_v46  ;;  %v2740_v28 = vpop.f32.mrb[43].mxu0  ;;  %v1709_v16 = vmul.f32 0.5, %v1703_v58 }
0x188f   :  { %v1713_v5 = vmul.f32 %v1711_v27, %v1703_v58  ;;  %v1712_v3 = vmul.f32 0.044715, %v1706_v63  ;;  %v1710_v26 = vmul.f32 0.5, %v1706_v63 }
0x1891   :  { %v1715_v4 = vmul.f32 %v1713_v5, %v1703_v58  ;;  %v1714_v8 = vmul.f32 %v1712_v3, %v1706_v63  ;;  %v1817_v5 = vrot.slane %v3331_v33, %v3181_v37 }
0x1893   :  { %v1717_v14 = vadd.f32 %v1715_v4, %v1703_v58  ;;  %v1716_v18 = vmul.f32 %v1714_v8, %v1706_v63 }
0x1895   :  { %v1719_v22 = vmul.f32 0.7978846, %v1717_v14  ;;  %v1718_v23 = vadd.f32 %v1716_v18, %v1706_v63 }
0x1897   :  { %2930 = vtanh.f32 %v1719_v22  ;;  %v1720_v24 = vmul.f32 0.7978846, %v1718_v23  ;;  %v1823_v22 = vrot.slane %v3331_v33, %v3186_v39 }
0x1899   :  { %2932 = vtanh.f32 %v1720_v24 }
0x18a1   :  { %v2931_v55 = vpop.eup %2930 }
0x18a2   :  { %v1723_v51 = vadd.f32 1.0, %v2931_v55 }
0x18a3   :  { %v2933_v13 = vpop.eup %2932 }
0x18a4   :  { %v1724_v30 = vadd.f32 1.0, %v2933_v13  ;;  %v1725_v17 = vmul.f32 %v1723_v51, %v1709_v16  ;;  %v2487_v13 = vld [vmem:[%s3624_s2 + $0x98] sm:$0xf] }
0x18a5   :  { %v3494_v16 = vunpack.c.l.bf16 %v2487_v13 }
0x18a6   :  { %v1726_v19 = vmul.f32 %v1724_v30, %v1710_v26 }
0x18a7   :  { %v1837_v33 = vrot.slane %v3494_v16, %v3042_v10 }
0x18a8   :  { %v1727_v31 = vpack.c.bf16 %v1726_v19, %v1725_v17 }
0x18aa   :  { %2746 = vmatmul.mubr.msk.bf16.vlgmr.msra.gmra.mrb[48].mxu1 %vm528_vm3, %v1727_v31 }
0x18ab   :  { %2765 = vmatprep.mubr.msk.bf16.mxu1 %vm2971_vm0, %v2970_v0 }
0x197d   :  { %v1779_v35 = vpop.f32.mrb[48].mxu1 }
0x197e   :  { %v1780_v59 = vadd.f32 %v1779_v35, %v1731_v32  ;;  %v2747_v61 = vpop.f32.mrb[49].mxu1 }
0x197f   :  { %v1782_v62 = vpop.f32.mrb[50].mxu1 }
0x1980   :  { %v1783_v36 = vadd.f32 %v1782_v62, %v1731_v32  ;;  %v2748_v1 = vpop.f32.mrb[51].mxu1  ;;  %v1786_v40 = vadd.f32 %v1780_v59, %v1650_v48 }
0x1982   :  { %v1788_v25 = vsel %vm42_vm1, %v1786_v40, 0.0  ;;  %v1787_v41 = vadd.f32 %v1783_v36, %v1651_v49  ;;  %v3467_v49 = vld [vmem:[%s3624_s2 + $0x78] ss:$8 sps:$4 sm:$0xff]  }
0x1983   :  { %1789 = vadd.xlane.f32.xlu1 %v1788_v25  ;;  %2750 = vmatpush3.bf16.msra.mxu0 %v3467_v49 }
0x1984   :  { %v1791_v42 = vsel %vm42_vm1, %v1787_v41, 0.0  ;;  %2751 = vmatprep.subr.bf16.mxu0 %v2970_v0 }
0x1985   :  { %1792 = vadd.xlane.f32.xlu0 %v1791_v42 }
0x1987   :  { %2752 = vmatpush3.bf16.msra.mxu0 %v3473_v57 }
0x1988   :  { %2757 = vmatprep.subr.bf16.mxu0 %v2970_v0 }
0x1a10   :  { %v1790_v29 = vpop.xlane.xlu1 %1789 }
0x1a11   :  { %v1794_v43 = vmul.f32 0.03125, %v1790_v29 }
0x1a12   :  { %v1793_v44 = vpop.xlane.xlu0 %1792 }
0x1a13   :  { %v1796_v50 = vsub.f32 %v1786_v40, %v1794_v43  ;;  %v1795_v7 = vmul.f32 0.03125, %v1793_v44 }
0x1a15   :  { %v1797_v52 = vsub.f32 %v1787_v41, %v1795_v7  ;;  %v1798_v53 = vmul.f32 %v1796_v50, %v1796_v50 }
0x1a17   :  { %v1800_v54 = vsel %vm42_vm1, %v1798_v53, 0.0  ;;  %v1799_v46 = vmul.f32 %v1797_v52, %v1797_v52 }
0x1a18   :  { %1801 = vadd.xlane.f32.xlu1 %v1800_v54 }
0x1a19   :  { %v1803_v48 = vsel %vm42_vm1, %v1799_v46, 0.0 }
0x1a1a   :  { %1804 = vadd.xlane.f32.xlu0 %v1803_v48 }
0x1aa5   :  { %v1802_v58 = vpop.xlane.xlu1 %1801 }
0x1aa6   :  { %v1806_v47 = vmul.f32 0.03125, %v1802_v58 }
0x1aa7   :  { %v1805_v56 = vpop.xlane.xlu0 %1804 }
0x1aa8   :  { %v1808_v27 = vadd.f32 1e-12, %v1806_v47  ;;  %v1807_v63 = vmul.f32 0.03125, %v1805_v56 }
0x1aaa   :  { %2934 = vrsqrt.f32 %v1808_v27  ;;  %v1809_v28 = vadd.f32 1e-12, %v1807_v63 }
0x1aac   :  { %2936 = vrsqrt.f32 %v1809_v28 }
0x1ab4   :  { %v2935_v3 = vpop.eup %2934 }
0x1ab5   :  { %v1812_v4 = vmul.f32 %v2935_v3, %v1796_v50 }
0x1ab6   :  { %v2937_v8 = vpop.eup %2936 }
0x1ab7   :  { %v1818_v14 = vmul.f32 %v1817_v5, %v1812_v4  ;;  %v1813_v18 = vmul.f32 %v2937_v8, %v1797_v52 }
0x1ab9   :  { %v1819_v23 = vmul.f32 %v1817_v5, %v1813_v18  ;;  %v3482_v24 = vadd.f32 %v1823_v22, %v1818_v14 }
0x1abb   :  { %v3484_v55 = vadd.f32 %v1823_v22, %v1819_v23 }
0x1abd   :  { %v1833_v51 = vpack.c.bf16 %v3484_v55, %v3482_v24 }
0x1abf   :  { %2754 = vmatmul.mubr.msk.bf16.vlgmr.msra.gmra.mrb[44].mxu0 %vm42_vm1, %v1833_v51 }
0x1ac0   :  { %2759 = vmatprep.mubr.msk.bf16.mxu0 %vm2971_vm0, %v2970_v0 }
0x1b92   :  { %v1887_v26 = vpop.f32.mrb[44].mxu0 }
0x1b93   :  { %v2755_v30 = vpop.f32.mrb[45].mxu0  ;;  %v1888_v19 = vadd.f32 %v1887_v26, %v1837_v33 }
0x1b94   :  { %v1890_v17 = vpop.f32.mrb[46].mxu0 }
0x1b95   :  { %v1891_v31 = vadd.f32 %v1890_v17, %v1837_v33  ;;  %v2756_v32 = vpop.f32.mrb[47].mxu0 }
0x1b97   :  { %v3498_v35 = vpack.c.bf16 %v1891_v31, %v1888_v19 }
0x1b99   :  { %2021 = vrot.lane.b32.xlu0 %v3498_v35, %s2974_s24  ;;  %1896 = vrot.lane.b32.xlu1 %v3498_v35, %s2973_s23 }
0x1b9d   :  { %2019 = vrot.lane.b32.xlu1 %v3498_v35, %s2972_s22 }
0x1c0b   :  { %v1897_v59 = vpop.permute.xlu1 %1896  ;;  %v2022_v61 = vpop.permute.xlu0 %2021 }
0x1c0c   :  { %v1902_v10 = vsel %vm91_vm2, %v1897_v59, 0  ;;  %v2027_v62 = vsel %vm91_vm2, %v2022_v61, 0 }
0x1c0d   :  { %2758 = vmatpush3.bf16.xpose.msra.mxu0 %v1902_v10 }
0x1c0e   :  { %2769 = vmatprep.subr.bf16.mxu0 %v2970_v0 }
0x1c0f   :  { %v2020_v36 = vpop.permute.xlu1 %2019 }
0x1c14   :  { %2760 = vmatmul.mubr.msk.bf16.vlgmr.msra.gmra.mrb[48].mxu0 %vm91_vm2, %v3498_v35 }
0x1c15   :  { %2770 = vmatpush3.bf16.xpose.msra.mxu0 %v2027_v62  ;;  %2771 = vmatprep.mubr.msk.bf16.mxu0 %vm2971_vm0, %v2970_v0 }
0x1c16   :  { %2781 = vmatprep.subr.bf16.mxu0 %v2970_v0 }
0x1c1c   :  { %2772 = vmatmul.mubr.msk.bf16.vlgmr.msra.gmra.mrb[52].mxu0 %vm91_vm2, %v2020_v36 }
0x1c1d   :  { %2785 = vmatprep.mubr.msk.bf16.mxu0 %vm2971_vm0, %v2970_v0 }
0x1ce7   :  { %v1938_v1 = vpop.f32.mrb[48].mxu0 }
0x1ce8   :  { %v1945_v40 = vmul.f32 0.25, %v1938_v1  ;;  %v2761_v25 = vpop.f32.mrb[49].mxu0 }
0x1ce9   :  { %v1941_v41 = vpop.f32.mrb[50].mxu0 }
0x1cea   :  { %v1946_v42 = vmul.f32 0.25, %v1941_v41  ;;  %v2762_v29 = vpop.f32.mrb[51].mxu0  ;;  %v1947_v43 = vadd.f32 %v3363_v6, %v1945_v40 }
0x1cec   :  { %v1949_v44 = vsel %vm91_vm2, %v1947_v43, -inf  ;;  %v1948_v50 = vadd.f32 %v3368_v21, %v1946_v42 }
0x1ced   :  { %1950 = vmax.xlane.f32.xlu1 %v1949_v44 }
0x1cee   :  { %v1952_v7 = vsel %vm91_vm2, %v1948_v50, -inf }
0x1cef   :  { %1953 = vmax.xlane.f32.xlu0 %v1952_v7  ;;  %v2063_v52 = vpop.f32.mrb[52].mxu0 }
0x1cf0   :  { %v2070_v53 = vmul.f32 0.25, %v2063_v52  ;;  %v2773_v54 = vpop.f32.mrb[53].mxu0 }
0x1cf1   :  { %v2066_v46 = vpop.f32.mrb[54].mxu0 }
0x1cf2   :  { %v2071_v48 = vmul.f32 0.25, %v2066_v46  ;;  %v2774_v58 = vpop.f32.mrb[55].mxu0  ;;  %v2072_v47 = vadd.f32 %v3363_v6, %v2070_v53 }
0x1cf4   :  { %v2074_v56 = vsel %vm91_vm2, %v2072_v47, -inf  ;;  %v2073_v27 = vadd.f32 %v3368_v21, %v2071_v48 }
0x1cf5   :  { %2075 = vmax.xlane.f32.xlu0 %v2074_v56 }
0x1cf6   :  { %v2077_v63 = vsel %vm91_vm2, %v2073_v27, -inf }
0x1cf7   :  { %2078 = vmax.xlane.f32.xlu1 %v2077_v63 }
0x1d7a   :  { %v1951_v28 = vpop.xlane.xlu1 %1950 }
0x1d7b   :  { %v1955_v5 = vsub.f32 %v1947_v43, %v1951_v28 }
0x1d7c   :  { %v1954_v3 = vpop.xlane.xlu0 %1953 }
0x1d7d   :  { %v1957_v4 = vmul.f32 1.442695, %v1955_v5  ;;  %v1956_v8 = vsub.f32 %v1948_v50, %v1954_v3 }
0x1d7f   :  { %2938 = vpow2.f32 %v1957_v4  ;;  %v1959_v14 = vmul.f32 1.442695, %v1956_v8 }
0x1d81   :  { %2940 = vpow2.f32 %v1959_v14  ;;  %v2856_v14 = vld [vmem:[%s3624_s2 + $0x7c] ss:$8 sps:$4 sm:$0xff]  }
0x1d82   :  { %v2076_v18 = vpop.xlane.xlu0 %2075 }
0x1d83   :  { %v2080_v22 = vsub.f32 %v2072_v47, %v2076_v18  ;;  %v2158_v18 = vrot.slane %v3494_v16, %v3120_v45  ;;  %v1121_v45 = vrot.slane %v3205_v9, %v3158_v60 }
0x1d84   :  { %v2079_v23 = vpop.xlane.xlu1 %2078 }
0x1d85   :  { %v2082_v6 = vmul.f32 1.442695, %v2080_v22  ;;  %v2081_v51 = vsub.f32 %v2073_v27, %v2079_v23 }
0x1d87   :  { %2942 = vpow2.f32 %v2082_v6  ;;  %v2084_v13 = vmul.f32 1.442695, %v2081_v51 }
0x1d89   :  { %v2939_v21 = vpop.eup %2938  ;;  %2944 = vpow2.f32 %v2084_v13 }
0x1d8a   :  { %v1961_v33 = vsel %vm91_vm2, %v2939_v21, 0.0 }
0x1d8b   :  { %v2941_v26 = vpop.eup %2940  ;;  %1962 = vadd.xlane.f32.xlu0 %v1961_v33 }
0x1d8c   :  { %v1964_v30 = vsel %vm91_vm2, %v2941_v26, 0.0 }
0x1d8d   :  { %1965 = vadd.xlane.f32.xlu1 %v1964_v30 }
0x1d91   :  { %v2943_v17 = vpop.eup %2942 }
0x1d92   :  { %v2086_v19 = vsel %vm91_vm2, %v2943_v17, 0.0 }
0x1d93   :  { %v2945_v31 = vpop.eup %2944  ;;  %2087 = vadd.xlane.f32.xlu0 %v2086_v19  ;;  %v1173_v19 = vadd.f32 %v3415_v2, %v1121_v45 }
0x1d94   :  { %v2089_v32 = vsel %vm91_vm2, %v2945_v31, 0.0 }
0x1d95   :  { %2090 = vadd.xlane.f32.xlu1 %v2089_v32  ;;  %v3569_v32 = vadd.f32 %v1173_v19, %v3292_v12 }
0x1da6   :  { %2097 = vrot.lane.b32.xlu1 %v3498_v35, %s2975_s29 }
0x1da9   :  { %1972 = vrot.lane.b32.xlu0 %v3498_v35, %s2976_s30 }
0x1daa   :  { %2159 = vrot.lane.b32.xlu1 %v3467_v49, %s2977_s8 }
0x1dae   :  { %2161 = vrot.lane.b32.xlu1 %v3473_v57, %s2977_s8 }
0x1e18   :  { %v1963_v59 = vpop.xlane.xlu0 %1962 }
0x1e19   :  { %2946 = vrcp.f32 %v1963_v59 }
0x1e1a   :  { %v1966_v10 = vpop.xlane.xlu1 %1965 }
0x1e1b   :  { %2948 = vrcp.f32 %v1966_v10 }
0x1e20   :  { %v2088_v61 = vpop.xlane.xlu0 %2087 }
0x1e21   :  { %2950 = vrcp.f32 %v2088_v61 }
0x1e22   :  { %v2091_v62 = vpop.xlane.xlu1 %2090 }
0x1e23   :  { %v2947_v36 = vpop.eup %2946  ;;  %2952 = vrcp.f32 %v2091_v62 }
0x1e24   :  { %v1973_v1 = vpop.permute.xlu0 %1972  ;;  %v1969_v25 = vmul.f32 %v2947_v36, %v2939_v21 }
0x1e25   :  { %v2949_v40 = vpop.eup %2948  ;;  %2764 = vmatpush3.bf16.msra.mxu1 %v1973_v1 }
0x1e26   :  { %v1970_v35 = vmul.f32 %v2949_v40, %v2941_v26  ;;  %2775 = vmatprep.subr.bf16.mxu1 %v2970_v0  ;;  %v2098_v41 = vpop.permute.xlu1 %2097 }
0x1e28   :  { %v1971_v49 = vpack.c.bf16 %v1970_v35, %v1969_v25 }
0x1e2a   :  { %2766 = vmatmul.mubr.msk.bf16.vlgmr.msra.gmra.mrb[52].mxu1 %vm91_vm2, %v1971_v49  ;;  %v2160_v50 = vpop.permute.xlu1 %2159  ;;  %v2857_v49 = vld [vmem:[%s3624_s2 + $0x8c] ss:$8 sps:$4 sm:$0xff]  }
0x1e2b   :  { %v2951_v57 = vpop.eup %2950  ;;  %2776 = vmatpush3.bf16.msra.mxu1 %v2098_v41  ;;  %2777 = vmatprep.mubr.msk.bf16.mxu1 %vm2971_vm0, %v2970_v0 }
0x1e2c   :  { %2789 = vmatprep.subr.bf16.mxu1 %v2970_v0  ;;  %v2094_v29 = vmul.f32 %v2951_v57, %v2943_v17  ;;  %2782 = vmatpush3.bf16.msra.mxu0 %v2160_v50 }
0x1e2d   :  { %v2953_v42 = vpop.eup %2952  ;;  %2783 = vmatprep.subr.bf16.mxu0 %v2970_v0 }
0x1e2e   :  { %v2095_v43 = vmul.f32 %v2953_v42, %v2945_v31  ;;  %v2162_v54 = vpop.permute.xlu1 %2161  ;;  %v1170_v31 = vadd.f32 %v3413_v38, %v1121_v45 }
0x1e30   :  { %v2096_v44 = vpack.c.bf16 %v2095_v43, %v2094_v29  ;;  %2784 = vmatpush3.bf16.msra.mxu0 %v2162_v54 }
0x1e31   :  { %2797 = vmatprep.subr.bf16.mxu0 %v2970_v0 }
0x1e32   :  { %2778 = vmatmul.mubr.msk.bf16.vlgmr.msra.gmra.mrb[56].mxu1 %vm91_vm2, %v2096_v44 }
0x1e33   :  { %2793 = vmatprep.mubr.msk.bf16.mxu1 %vm2971_vm0, %v2970_v0  ;;  %2790 = vmatpush3.bf16.msra.mxu1 %v2856_v14 }
0x1e34   :  { %2791 = vmatprep.subr.bf16.mxu1 %v2970_v0 }
0x1e37   :  { %2792 = vmatpush3.bf16.msra.mxu1 %v2857_v49 }
0x1efd   :  { %v2012_v7 = vpop.f32.mrb[52].mxu1 }
0x1efe   :  { %v2767_v52 = vpop.f32.mrb[53].mxu1 }
0x1eff   :  { %v2015_v53 = vpop.f32.mrb[54].mxu1 }
0x1f00   :  { %v2768_v46 = vpop.f32.mrb[55].mxu1 }
0x1f05   :  { %v2137_v48 = vpop.f32.mrb[56].mxu1 }
0x1f06   :  { %v2779_v58 = vpop.f32.mrb[57].mxu1 }
0x1f07   :  { %v2140_v47 = vpop.f32.mrb[58].mxu1 }
0x1f08   :  { %v2829_v56 = vpack.i.bf16 %v2140_v47, %v2137_v48  ;;  %v2780_v27 = vpop.f32.mrb[59].mxu1  ;;  %v2240_v48 = vrot.slane %v3494_v16, %v3133_v15  ;;  %v2253_v15 = vrot.slane %v3494_v16, %v3150_v34 }
0x1f0a   :  { %2830 = vrot.lane.b32.xlu0 %v2829_v56, %s2978_s9 }
0x1f7c   :  { %v2831_v63 = vpop.permute.xlu0 %2830 }
0x1f7d   :  { %v2833_v28 = vunpack.i.h.bf16 %v2831_v63  ;;  %v2832_v5 = vunpack.i.l.bf16 %v2831_v63  ;;  %v2246_v63 = vrot.slane %v3494_v16, %v3138_v20 }
0x1f7f   :  { %v2153_v3 = vsel %vm91_vm2, %v2015_v53, %v2833_v28  ;;  %v2152_v4 = vsel %vm91_vm2, %v2012_v7, %v2832_v5 }
0x1f80   :  { %v2154_v8 = vpack.c.bf16 %v2153_v3, %v2152_v4 }
0x1f82   :  { %2786 = vmatmul.mubr.msk.bf16.vlgmr.msra.gmra.mrb[56].mxu0 %vm42_vm1, %v2154_v8 }
0x1f83   :  { %2801 = vmatprep.mubr.msk.bf16.mxu0 %vm2971_vm0, %v2970_v0 }
0x2055   :  { %v2202_v22 = vpop.f32.mrb[56].mxu0 }
0x2056   :  { %v2203_v23 = vadd.f32 %v2202_v22, %v2158_v18  ;;  %v2787_v6 = vpop.f32.mrb[57].mxu0 }
0x2057   :  { %v2205_v51 = vpop.f32.mrb[58].mxu0 }
0x2058   :  { %v2206_v13 = vadd.f32 %v2205_v51, %v2158_v18  ;;  %v2788_v21 = vpop.f32.mrb[59].mxu0  ;;  %v2209_v33 = vadd.f32 %v2203_v23, %v3482_v24  ;;  %v1181_v24 = vsel %vm42_vm1, %v3569_v32, 0.0 }
0x205a   :  { %v2211_v26 = vsel %vm42_vm1, %v2209_v33, 0.0  ;;  %v2210_v30 = vadd.f32 %v2206_v13, %v3484_v55  ;;  %v1176_v55 = vadd.f32 %v1170_v31, %v3290_v11 }
0x205b   :  { %2212 = vadd.xlane.f32.xlu0 %v2211_v26 }
0x205c   :  { %v2214_v17 = vsel %vm42_vm1, %v2210_v30, 0.0  ;;  %v1178_v59 = vsel %vm42_vm1, %v1176_v55, 0.0 }
0x205d   :  { %2215 = vadd.xlane.f32.xlu1 %v2214_v17 }
0x206e   :  { %2329 = vrot.lane.b32.xlu1 %v2856_v14, %s2976_s30 }
0x2092   :  { %1182 = vadd.xlane.f32.xlu1 %v1181_v24 }
0x2096   :  { %1179 = vadd.xlane.f32.xlu1 %v1178_v59 }
0x20e8   :  { %v2213_v10 = vpop.xlane.xlu0 %2212 }
0x20e9   :  { %v2217_v61 = vmul.f32 0.03125, %v2213_v10 }
0x20ea   :  { %v2216_v62 = vpop.xlane.xlu1 %2215 }
0x20eb   :  { %v2219_v36 = vsub.f32 %v2209_v33, %v2217_v61  ;;  %v2218_v1 = vmul.f32 0.03125, %v2216_v62 }
0x20ed   :  { %v2220_v2 = vsub.f32 %v2210_v30, %v2218_v1  ;;  %v2221_v40 = vmul.f32 %v2219_v36, %v2219_v36 }
0x20ee   :  { %v2330_v38 = vpop.permute.xlu1 %2329 }
0x20ef   :  { %v2223_v12 = vsel %vm42_vm1, %v2221_v40, 0.0  ;;  %v2222_v25 = vmul.f32 %v2220_v2, %v2220_v2  ;;  %v2337_v35 = vsel %vm528_vm3, %v2330_v38, 0  ;;  %v2328_v40 = vrot.slane %v3494_v16, %v3158_v60 }
0x20f0   :  { %2224 = vadd.xlane.f32.xlu0 %v2223_v12  ;;  %2798 = vmatpush3.bf16.xpose.msra.mxu0 %v2337_v35 }
0x20f1   :  { %2799 = vmatprep.subr.bf16.mxu0 %v2970_v0  ;;  %v2226_v11 = vsel %vm42_vm1, %v2222_v25, 0.0 }
0x20f4   :  { %2227 = vadd.xlane.f32.xlu0 %v2226_v11 }
0x210a   :  { %2331 = vrot.lane.b32.xlu0 %v2857_v49, %s2976_s30 }
0x211f   :  { %v1183_v41 = vpop.xlane.xlu1 %1182 }
0x2120   :  { %v1185_v35 = vmul.f32 0.03125, %v1183_v41 }
0x2123   :  { %v1180_v57 = vpop.xlane.xlu1 %1179 }
0x2124   :  { %v1184_v42 = vmul.f32 0.03125, %v1180_v57 }
0x2126   :  { %v3583_v29 = vsub.f32 %v1176_v55, %v1184_v42 }
0x2128   :  { %v1188_v43 = vmul.f32 %v3583_v29, %v3583_v29 }
0x212a   :  { %v1190_v0 = vsel %vm42_vm1, %v1188_v43, 0.0  ;;  %v1187_v43 = vsub.f32 %v3569_v32, %v1185_v35 }
0x212b   :  { %1191 = vadd.xlane.f32.xlu1 %v1190_v0 }
0x217d   :  { %v2225_v44 = vpop.xlane.xlu0 %2224 }
0x217e   :  { %v2229_v50 = vmul.f32 0.03125, %v2225_v44 }
0x2180   :  { %v2231_v7 = vadd.f32 1e-12, %v2229_v50 }
0x2181   :  { %v2228_v52 = vpop.xlane.xlu0 %2227 }
0x2182   :  { %2954 = vrsqrt.f32 %v2231_v7  ;;  %v2230_v53 = vmul.f32 0.03125, %v2228_v52  ;;  %v1189_v7 = vmul.f32 %v1187_v43, %v1187_v43 }
0x2184   :  { %v2232_v54 = vadd.f32 1e-12, %v2230_v53  ;;  %v1193_v60 = vsel %vm42_vm1, %v1189_v7, 0.0 }
0x2185   :  { %v2332_v8 = vpop.permute.xlu0 %2331 }
0x2186   :  { %2956 = vrsqrt.f32 %v2232_v54  ;;  %v2340_v14 = vsel %vm528_vm3, %v2332_v8, 0 }
0x2187   :  { %2800 = vmatpush3.bf16.xpose.msra.mxu0 %v2340_v14  ;;  %v1207_v14 = vrot.slane %v3205_v9, %v3181_v37 }
0x218c   :  { %v2955_v46 = vpop.eup %2954 }
0x218d   :  { %v2235_v58 = vmul.f32 %v2955_v46, %v2219_v36 }
0x218f   :  { %v2241_v56 = vmul.f32 %v2240_v48, %v2235_v58 }
0x2190   :  { %v2957_v47 = vpop.eup %2956 }
0x2191   :  { %v2236_v27 = vmul.f32 %v2957_v47, %v2220_v2  ;;  %v2247_v5 = vadd.f32 %v2246_v63, %v2241_v56 }
0x2193   :  { %v2242_v28 = vmul.f32 %v2240_v48, %v2236_v27 }
0x2195   :  { %v2248_v3 = vadd.f32 %v2246_v63, %v2242_v28 }
0x2197   :  { %v2249_v4 = vpack.c.bf16 %v2248_v3, %v2247_v5 }
0x2199   :  { %2794 = vmatmul.mubr.msk.bf16.vlgmr.msra.gmra.mrb[60].mxu1 %vm42_vm1, %v2249_v4 }
0x21b8   :  { %v1192_v52 = vpop.xlane.xlu1 %1191 }
0x21b9   :  { %v1196_v41 = vmul.f32 0.03125, %v1192_v52 }
0x21bb   :  { %v1198_v58 = vadd.f32 1e-12, %v1196_v41 }
0x226c   :  { %v2299_v18 = vpop.f32.mrb[60].mxu1 }
0x226d   :  { %v2300_v22 = vadd.f32 %v2299_v18, %v2253_v15  ;;  %v2795_v23 = vpop.f32.mrb[61].mxu1 }
0x226e   :  { %v2302_v6 = vpop.f32.mrb[62].mxu1  ;;  %v1213_v23 = vrot.slane %v3205_v9, %v3186_v39 }
0x226f   :  { %v2308_v51 = vmul.f32 0.044715, %v2300_v22  ;;  %v2303_v13 = vadd.f32 %v2302_v6, %v2253_v15  ;;  %v2796_v20 = vpop.f32.mrb[63].mxu1  ;;  %v2306_v10 = vmul.f32 0.5, %v2300_v22 }
0x2271   :  { %v2310_v21 = vmul.f32 %v2308_v51, %v2300_v22  ;;  %v2309_v33 = vmul.f32 0.044715, %v2303_v13  ;;  %v2307_v61 = vmul.f32 0.5, %v2303_v13 }
0x2273   :  { %v2312_v26 = vmul.f32 %v2310_v21, %v2300_v22  ;;  %v2311_v30 = vmul.f32 %v2309_v33, %v2303_v13 }
0x2275   :  { %v2314_v17 = vadd.f32 %v2312_v26, %v2300_v22  ;;  %v2313_v45 = vmul.f32 %v2311_v30, %v2303_v13 }
0x2277   :  { %v2316_v19 = vmul.f32 0.7978846, %v2314_v17  ;;  %v2315_v31 = vadd.f32 %v2313_v45, %v2303_v13 }
0x2279   :  { %2958 = vtanh.f32 %v2316_v19  ;;  %v2317_v24 = vmul.f32 0.7978846, %v2315_v31  ;;  %v2414_v19 = vrot.slane %v3494_v16, %v3181_v37 }
0x227b   :  { %2960 = vtanh.f32 %v2317_v24  ;;  %v2420_v24 = vrot.slane %v3494_v16, %v3186_v39 }
0x227c   :  { %2962 = vrsqrt.f32 %v1198_v58 }
0x2283   :  { %v2959_v55 = vpop.eup %2958 }
0x2284   :  { %v2320_v34 = vadd.f32 1.0, %v2959_v55 }
0x2285   :  { %v2961_v59 = vpop.eup %2960 }
0x2286   :  { %v2321_v62 = vadd.f32 1.0, %v2961_v59  ;;  %v2322_v36 = vmul.f32 %v2320_v34, %v2306_v10  ;;  %v2963_v8 = vpop.eup %2962 }
0x2287   :  { %v1202_v15 = vmul.f32 %v2963_v8, %v3583_v29 }
0x2288   :  { %v2323_v1 = vmul.f32 %v2321_v62, %v2307_v61 }
0x2289   :  { %v1208_v6 = vmul.f32 %v1207_v14, %v1202_v15 }
0x228a   :  { %v2324_v2 = vpack.c.bf16 %v2323_v1, %v2322_v36 }
0x228b   :  { %v1214_v20 = vadd.f32 %v1213_v23, %v1208_v6 }
0x228c   :  { %2802 = vmatmul.mubr.msk.bf16.vlgmr.msra.gmra.mrb[60].mxu0 %vm528_vm3, %v2324_v2 }
0x235f   :  { %v2376_v38 = vpop.f32.mrb[60].mxu0 }
0x2360   :  { %v2803_v12 = vpop.f32.mrb[61].mxu0  ;;  %v2377_v11 = vadd.f32 %v2376_v38, %v2328_v40 }
0x2361   :  { %v2379_v25 = vpop.f32.mrb[62].mxu0 }
0x2362   :  { %v2380_v49 = vadd.f32 %v2379_v25, %v2328_v40  ;;  %v2804_v57 = vpop.f32.mrb[63].mxu0  ;;  %v2383_v0 = vadd.f32 %v2377_v11, %v2247_v5 }
0x2364   :  { %v2384_v42 = vadd.f32 %v2380_v49, %v2248_v3  ;;  %v2385_v50 = vsel %vm42_vm1, %v2383_v0, 0.0 }
0x2366   :  { %v2388_v44 = vsel %vm42_vm1, %v2384_v42, 0.0 }
0x2367   :  { %2389 = vadd.xlane.f32.xlu0 %v2388_v44 }
0x236b   :  { %2386 = vadd.xlane.f32.xlu0 %v2385_v50 }
0x236f   :  { %1194 = vadd.xlane.f32.xlu0 %v1193_v60 }
0x23f4   :  { %v2390_v53 = vpop.xlane.xlu0 %2389 }
0x23f5   :  { %v2392_v54 = vmul.f32 0.03125, %v2390_v53 }
0x23f7   :  { %v2394_v46 = vsub.f32 %v2384_v42, %v2392_v54 }
0x23f8   :  { %v2387_v48 = vpop.xlane.xlu0 %2386 }
0x23f9   :  { %v2391_v47 = vmul.f32 0.03125, %v2387_v48  ;;  %v2396_v32 = vmul.f32 %v2394_v46, %v2394_v46 }
0x23fb   :  { %v2393_v56 = vsub.f32 %v2383_v0, %v2391_v47  ;;  %v2400_v27 = vsel %vm42_vm1, %v2396_v32, 0.0 }
0x23fc   :  { %2401 = vadd.xlane.f32.xlu1 %v2400_v27  ;;  %v1195_v63 = vpop.xlane.xlu0 %1194 }
0x23fd   :  { %v1197_v28 = vmul.f32 0.03125, %v1195_v63  ;;  %v2395_v5 = vmul.f32 %v2393_v56, %v2393_v56 }
0x23ff   :  { %v1199_v3 = vadd.f32 1e-12, %v1197_v28  ;;  %v2397_v4 = vsel %vm42_vm1, %v2395_v5, 0.0 }
0x2400   :  { %2398 = vadd.xlane.f32.xlu0 %v2397_v4 }
0x2401   :  { %2964 = vrsqrt.f32 %v1199_v3 }
0x240b   :  { %v2965_v18 = vpop.eup %2964 }
0x240c   :  { %v1203_v22 = vmul.f32 %v2965_v18, %v1187_v43 }
0x240e   :  { %v1209_v51 = vmul.f32 %v1207_v14, %v1203_v22 }
0x2410   :  { %v1215_v13 = vadd.f32 %v1213_v23, %v1209_v51 }
0x2412   :  { %v1217_v21 = vrot.slane %v1215_v13, 7 }
0x2414   :  { %v1220_v33 = vsel %vm1219_vm4, %v1214_v20, %v1217_v21 }
0x2415   :  { %1222 = vst.msk [vmem:[%s3627_s3] sm:$0x3] %vm1221_vm5, %v1220_v33 }
0x2489   :  { %v2402_v29 = vpop.xlane.xlu1 %2401 }
0x248a   :  { %v2404_v26 = vmul.f32 0.03125, %v2402_v29 }
0x248c   :  { %v2406_v30 = vadd.f32 1e-12, %v2404_v26 }
0x248d   :  { %v2399_v17 = vpop.xlane.xlu0 %2398 }
0x248e   :  { %2966 = vrsqrt.f32 %v2406_v30  ;;  %v2403_v9 = vmul.f32 0.03125, %v2399_v17 }
0x2490   :  { %v2405_v45 = vadd.f32 1e-12, %v2403_v9 }
0x2492   :  { %2968 = vrsqrt.f32 %v2405_v45 }
0x2498   :  { %v2967_v31 = vpop.eup %2966 }
0x2499   :  { %v2410_v55 = vmul.f32 %v2967_v31, %v2394_v46 }
0x249b   :  { %v2416_v34 = vmul.f32 %v2414_v19, %v2410_v55 }
0x249c   :  { %v2969_v59 = vpop.eup %2968 }
0x249d   :  { %v2422_v10 = vadd.f32 %v2420_v24, %v2416_v34  ;;  %v2409_v61 = vmul.f32 %v2969_v59, %v2393_v56 }
0x249f   :  { %v2415_v62 = vmul.f32 %v2414_v19, %v2409_v61  ;;  %v2424_v36 = vrot.slane %v2422_v10, 7 }
0x24a1   :  { %v2421_v1 = vadd.f32 %v2420_v24, %v2415_v62 }
0x24a3   :  { %v2426_v2 = vsel %vm1219_vm4, %v2421_v1, %v2424_v36 }
0x24a4   :  { %2500 = vst.msk [vmem:[%s3627_s3 + $0x2] sm:$0x3] %vm1221_vm5, %v2426_v2 }

</bundles_post_ra>
